<compile_context>
chip_gen: v7x
topology: tpu7x:2x2x1
jax: 0.10.0
libtpu: 0.0.40
codegen_flags: <defaults>
</compile_context>

<pallas_src>
import functools

import jax
import jax.numpy as jnp
from jax import lax
from jax.experimental import pallas as pl
from jax.experimental.pallas import tpu as pltpu

VOCAB = 256      # vocab_size
DIM = 128        # dimension
BATCH = 256      # batch rows (one 256-row step fills the MXU M dimension)
CONTEXT = 4      # context window length (dim=1 of the input token matrix)


def _onehot_dtype_for_device():
    """bf16 count build on chips with a bf16 VALU (v6e/v7x); f32 otherwise."""
    try:
        kind = jax.devices()[0].device_kind.lower()
    except Exception:  # defensive: f32 is always correct
        return jnp.float32
    if ("v6" in kind) or ("v7" in kind) or ("7x" in kind):
        return jnp.bfloat16
    return jnp.float32


def cbow_kernel(idx_ref, fw_ref, b_ref, out_ref, *, onehot_dtype):
    # idx_ref : (BATCH, CONTEXT) int32  token ids
    # fw_ref  : (VOCAB, VOCAB)   bf16   fused weight  (embed @ W_fc1^T) / CONTEXT
    # b_ref   : (1, VOCAB)       f32    fc1 bias
    # out_ref : (BATCH, VOCAB)   f32    logits
    idx = idx_ref[...]
    vocab_ids = lax.broadcasted_iota(jnp.int32, (BATCH, VOCAB), 1)

    # counts[b, v] = #{c : idx[b, c] == v}.  Values {0..CONTEXT} are exact in
    # bf16; the 1/CONTEXT mean scale is folded into fw_ref, so embedding-gather
    # + mean + fc1 collapses to a single MXU matmul.
    # NOTE: out-of-range token ids silently contribute nothing here, whereas
    # PyTorch nn.Embedding would raise.
    one = jnp.asarray(1, onehot_dtype)
    zero = jnp.asarray(0, onehot_dtype)
    counts = jnp.zeros((BATCH, VOCAB), onehot_dtype)
    for c in range(CONTEXT):                       # static unroll; CONTEXT is tiny
        tok_c = idx[:, c][:, None]                 # (BATCH, 1)
        counts = counts + jnp.where(tok_c == vocab_ids, one, zero)

    # Single MXU matmul: (BATCH, VOCAB) @ (VOCAB, VOCAB), f32 accumulation.
    logits = jnp.dot(counts.astype(fw_ref.dtype), fw_ref[...],
                     preferred_element_type=jnp.float32)
    out_ref[...] = logits + b_ref[...]


def make_cbow_forward():
    kernel = functools.partial(cbow_kernel, onehot_dtype=_onehot_dtype_for_device())

    @jax.jit
    def cbow_forward(idx, fused_w, bias_row):
        return pl.pallas_call(
            kernel,
            out_shape=jax.ShapeDtypeStruct((BATCH, VOCAB), jnp.float32),
            grid=(1,),  # single step: kernel is overhead-bound, not capacity-bound
            in_specs=[
                pl.BlockSpec((BATCH, CONTEXT), lambda i: (0, 0)),  # token ids
                pl.BlockSpec((VOCAB, VOCAB), lambda i: (0, 0)),    # fused weight (VMEM resident)
                pl.BlockSpec((1, VOCAB), lambda i: (0, 0)),        # bias row (VMEM resident)
            ],
            out_specs=pl.BlockSpec((BATCH, VOCAB), lambda i: (0, 0)),
            compiler_params=pltpu.CompilerParams(
                dimension_semantics=("arbitrary",)),
        )(idx, fused_w, bias_row)

    return cbow_forward


if __name__ == "__main__":
    key = jax.random.PRNGKey(0)
    k_idx, k_emb, k_w, k_b = jax.random.split(key, 4)

    # Shapes / init follow CBOWNet.__init__(vocab_size=VOCAB, dimension=DIM).
    idx = jax.random.randint(k_idx, (BATCH, CONTEXT), 0, VOCAB, dtype=jnp.int32)
    emb = jax.random.normal(k_emb, (VOCAB, DIM), dtype=jnp.float32)        # nn.Embedding weight
    bound = 1.0 / (DIM ** 0.5)
    w = jax.random.uniform(k_w, (VOCAB, DIM), jnp.float32, -bound, bound)  # nn.Linear weight (out, in)
    bias = jax.random.uniform(k_b, (VOCAB,), jnp.float32, -bound, bound)   # nn.Linear bias

    # One-time parameter prep (hoisted out of the per-call path):
    #   fused_w = (embed @ W_fc1^T) / CONTEXT  -> (VOCAB, VOCAB) bf16 MXU operand
    #   bias laid out as a lane-dense (1, VOCAB) f32 row.
    fused_w = (jnp.dot(emb, w.T, precision="highest") / CONTEXT).astype(jnp.bfloat16)
    bias_row = bias.reshape(1, VOCAB)

    cbow_forward = make_cbow_forward()
    out = jax.block_until_ready(cbow_forward(idx, fused_w, bias_row))

    # Pure-JAX f32 reference of the PyTorch forward.
    ctx = jnp.take(emb, idx, axis=0).mean(axis=1)              # (BATCH, DIM)
    ref = ctx @ w.T + bias                                     # (BATCH, VOCAB)

    assert out.shape == (BATCH, VOCAB)
    assert jnp.allclose(out, ref, atol=3e-2, rtol=3e-2), float(jnp.max(jnp.abs(out - ref)))

    print("KERNEL_OK")
</pallas_src>

<mosaic_0001>
module attributes {stable_mosaic.version = 11 : i64} {
  func.func @cbow_kernel(%arg0: i32, %arg1: memref<256x4xi32, #tpu.memory_space<vmem>>, %arg2: memref<256x256xbf16, #tpu.memory_space<vmem>>, %arg3: memref<1x256xf32, #tpu.memory_space<vmem>>, %arg4: memref<256x256xf32, #tpu.memory_space<vmem>>) attributes {dimension_semantics = [#tpu.dimension_semantics<arbitrary>], iteration_bounds = array<i64: 1>, scalar_prefetch = 0 : i64, scratch_operands = 0 : i64, tpu.core_type = #tpu.core_type<tc>, window_params = [{pipeline_mode = #tpu.pipeline_mode<synchronous>, transform_indices = @transform_0, window_bounds = array<i64: 256, 4>}, {pipeline_mode = #tpu.pipeline_mode<synchronous>, transform_indices = @transform_1, window_bounds = array<i64: 256, 256>}, {pipeline_mode = #tpu.pipeline_mode<synchronous>, transform_indices = @transform_2, window_bounds = array<i64: 1, 256>}, {pipeline_mode = #tpu.pipeline_mode<synchronous>, transform_indices = @transform_3, window_bounds = array<i64: 256, 256>}]} {
    %c0 = arith.constant 0 : index
    %c0_0 = arith.constant 0 : index
    %0 = vector.load %arg1[%c0, %c0_0] : memref<256x4xi32, #tpu.memory_space<vmem>>, vector<256x4xi32>
    %1 = tpu.iota {dimensions = array<i32: 1>} : vector<256x256xi32>
    %cst = arith.constant 0.000000e+00 : f32
    %2 = vector.broadcast %cst : f32 to vector<256x256xf32>
    %3 = vector.extract_strided_slice %0 {offsets = [0, 0], sizes = [256, 1], strides = [1, 1]} : vector<256x4xi32> to vector<256x1xi32>
    %4 = vector.shape_cast %3 : vector<256x1xi32> to vector<256xi32>
    %5 = vector.shape_cast %4 : vector<256xi32> to vector<256x1xi32>
    %6 = vector.broadcast %5 : vector<256x1xi32> to vector<256x256xi32>
    %7 = arith.cmpi eq, %6, %1 : vector<256x256xi32>
    %cst_1 = arith.constant 1.000000e+00 : f32
    %cst_2 = arith.constant 0.000000e+00 : f32
    %8 = vector.broadcast %cst_1 : f32 to vector<256x256xf32>
    %9 = vector.broadcast %cst_2 : f32 to vector<256x256xf32>
    %10 = arith.select %7, %8, %9 : vector<256x256xi1>, vector<256x256xf32>
    %11 = arith.addf %2, %10 : vector<256x256xf32>
    %12 = vector.extract_strided_slice %0 {offsets = [0, 1], sizes = [256, 1], strides = [1, 1]} : vector<256x4xi32> to vector<256x1xi32>
    %13 = vector.shape_cast %12 : vector<256x1xi32> to vector<256xi32>
    %14 = vector.shape_cast %13 : vector<256xi32> to vector<256x1xi32>
    %15 = vector.broadcast %14 : vector<256x1xi32> to vector<256x256xi32>
    %16 = arith.cmpi eq, %15, %1 : vector<256x256xi32>
    %cst_3 = arith.constant 1.000000e+00 : f32
    %cst_4 = arith.constant 0.000000e+00 : f32
    %17 = vector.broadcast %cst_3 : f32 to vector<256x256xf32>
    %18 = vector.broadcast %cst_4 : f32 to vector<256x256xf32>
    %19 = arith.select %16, %17, %18 : vector<256x256xi1>, vector<256x256xf32>
    %20 = arith.addf %11, %19 : vector<256x256xf32>
    %21 = vector.extract_strided_slice %0 {offsets = [0, 2], sizes = [256, 1], strides = [1, 1]} : vector<256x4xi32> to vector<256x1xi32>
    %22 = vector.shape_cast %21 : vector<256x1xi32> to vector<256xi32>
    %23 = vector.shape_cast %22 : vector<256xi32> to vector<256x1xi32>
    %24 = vector.broadcast %23 : vector<256x1xi32> to vector<256x256xi32>
    %25 = arith.cmpi eq, %24, %1 : vector<256x256xi32>
    %cst_5 = arith.constant 1.000000e+00 : f32
    %cst_6 = arith.constant 0.000000e+00 : f32
    %26 = vector.broadcast %cst_5 : f32 to vector<256x256xf32>
    %27 = vector.broadcast %cst_6 : f32 to vector<256x256xf32>
    %28 = arith.select %25, %26, %27 : vector<256x256xi1>, vector<256x256xf32>
    %29 = arith.addf %20, %28 : vector<256x256xf32>
    %30 = vector.extract_strided_slice %0 {offsets = [0, 3], sizes = [256, 1], strides = [1, 1]} : vector<256x4xi32> to vector<256x1xi32>
    %31 = vector.shape_cast %30 : vector<256x1xi32> to vector<256xi32>
    %32 = vector.shape_cast %31 : vector<256xi32> to vector<256x1xi32>
    %33 = vector.broadcast %32 : vector<256x1xi32> to vector<256x256xi32>
    %34 = arith.cmpi eq, %33, %1 : vector<256x256xi32>
    %cst_7 = arith.constant 1.000000e+00 : f32
    %cst_8 = arith.constant 0.000000e+00 : f32
    %35 = vector.broadcast %cst_7 : f32 to vector<256x256xf32>
    %36 = vector.broadcast %cst_8 : f32 to vector<256x256xf32>
    %37 = arith.select %34, %35, %36 : vector<256x256xi1>, vector<256x256xf32>
    %38 = arith.addf %29, %37 : vector<256x256xf32>
    %39 = arith.truncf %38 : vector<256x256xf32> to vector<256x256xbf16>
    %c0_9 = arith.constant 0 : index
    %c0_10 = arith.constant 0 : index
    %40 = vector.load %arg2[%c0_9, %c0_10] : memref<256x256xbf16, #tpu.memory_space<vmem>>, vector<256x256xbf16>
    %cst_11 = arith.constant dense<0.000000e+00> : vector<256x256xf32>
    %41 = tpu.matmul %39, %40, %cst_11 {dimension_numbers = #tpu.dot_dimension_numbers<[1], [0], [0], [1], [0, 0, 1, 1], [], []>} : vector<256x256xbf16>, vector<256x256xbf16>, vector<256x256xf32> -> vector<256x256xf32>
    %c0_12 = arith.constant 0 : index
    %c0_13 = arith.constant 0 : index
    %42 = vector.load %arg3[%c0_12, %c0_13] : memref<1x256xf32, #tpu.memory_space<vmem>>, vector<1x256xf32>
    %43 = vector.broadcast %42 : vector<1x256xf32> to vector<256x256xf32>
    %44 = arith.addf %41, %43 : vector<256x256xf32>
    %c0_14 = arith.constant 0 : index
    %c0_15 = arith.constant 0 : index
    %45 = vector.load %arg4[%c0_14, %c0_15] : memref<256x256xf32, #tpu.memory_space<vmem>>, vector<256x256xf32>
    tpu.vector_store %arg4[%c0_14, %c0_15], %44 {strides = array<i32>} : memref<256x256xf32, #tpu.memory_space<vmem>>, vector<256x256xf32>,
    return
  }
  func.func @transform_0(%arg0: i32) -> (i32, i32) {
    %c0_i32 = arith.constant 0 : i32
    %c0_i32_0 = arith.constant 0 : i32
    %c0_i32_1 = arith.constant 0 : i32
    return %c0_i32, %c0_i32_0 : i32, i32
  }
  func.func @transform_1(%arg0: i32) -> (i32, i32) {
    %c0_i32 = arith.constant 0 : i32
    %c0_i32_0 = arith.constant 0 : i32
    %c0_i32_1 = arith.constant 0 : i32
    return %c0_i32, %c0_i32_0 : i32, i32
  }
  func.func @transform_2(%arg0: i32) -> (i32, i32) {
    %c0_i32 = arith.constant 0 : i32
    %c0_i32_0 = arith.constant 0 : i32
    %c0_i32_1 = arith.constant 0 : i32
    return %c0_i32, %c0_i32_0 : i32, i32
  }
  func.func @transform_3(%arg0: i32) -> (i32, i32) {
    %c0_i32 = arith.constant 0 : i32
    %c0_i32_0 = arith.constant 0 : i32
    %c0_i32_1 = arith.constant 0 : i32
    return %c0_i32, %c0_i32_0 : i32, i32
  }
}

</mosaic_0001>

<bundles_post_ra>
// kernel: cbow_forward.1
= control target key start
LH: loop header
LB: loop body
LE: loop exit
PB: predicated region body
PF: predicated region fallthrough
CT: control target
= control target key end

     0   :  { %v1893_v2 = vmov 0   ;;  %s3567_s0 = inlined_call_operand.vmem [shape: s32[256,4], index: 0, kind: input, shape index: {}]   ;;  %s3568_s1 = inlined_call_operand.vmem [shape: bf16[256,256], index: 1, kind: input, shape index: {}]   ;;  %s3569_s2 = inlined_call_operand.vmem [shape: f32[1,256], index: 2, kind: input, shape index: {}]   ;;  %s3570_s3 = inlined_call_operand.hbm [shape: f32[256,256], index: 3, kind: output, shape index: {}]  }
   0x1   :  { %v1924_v0 = vld [vmem:[%s3567_s0 + $0x10] sm:$0xff]  ;;  %v1929_v1 = vld [vmem:[%s3567_s0] sm:$0xff]  ;;  %1784 = vset.pattern.permute.xlu1 %v1893_v2  ;;  %1783 = vset.pattern.permute.xlu0 %v1893_v2  ;;  %v1936_v3 = vld [vmem:[%s3567_s0 + $0x18] sm:$0xff] }
   0x2   :  { %57 = vperm.xlu1 %1784, %v1924_v0   ;;  %51 = vperm.xlu0 %1783, %v1929_v1   ;;  %v1941_v4 = vld [vmem:[%s3567_s0 + $0x8] sm:$0xff]  ;;  %v1953_v6 = vld [vmem:[%s3567_s0 + $0x20] sm:$0xff]  ;;  %v1960_v7 = vld [vmem:[%s3567_s0 + $0x38] sm:$0xff] }
   0x3   :  { %v1948_v5 = vld [vmem:[%s3567_s0 + $0x28] sm:$0xff]  ;;  %v1965_v8 = vld [vmem:[%s3567_s0 + $0x30] sm:$0xff]  ;;  %v1975_v10 = vld [vmem:[%s3567_s0 + $0x40] sm:$0xff] }
   0x4   :  { %v1970_v9 = vld [vmem:[%s3567_s0 + $0x48] sm:$0xff]  ;;  %v1982_v11 = vld [vmem:[%s3567_s0 + $0x58] sm:$0xff]  ;;  %v1987_v12 = vld [vmem:[%s3567_s0 + $0x50] sm:$0xff] }
   0x6   :  { %60 = vperm.xlu1 %1784, %v1936_v3   ;;  %54 = vperm.xlu0 %1783, %v1941_v4  }
   0xa   :  { %66 = vperm.xlu1 %1784, %v1948_v5   ;;  %63 = vperm.xlu0 %1783, %v1953_v6  }
   0xe   :  { %72 = vperm.xlu1 %1784, %v1960_v7   ;;  %69 = vperm.xlu0 %1783, %v1965_v8  }
  0x12   :  { %78 = vperm.xlu1 %1784, %v1970_v9   ;;  %75 = vperm.xlu0 %1783, %v1975_v10  }
  0x13   :  { %8 = vsyncpa [#allocation3], 0  ;;  %v1996_v13 = vld [vmem:[%s3567_s0 + $0x68] sm:$0xff]  ;;  %v2001_v14 = vld [vmem:[%s3567_s0 + $0x60] sm:$0xff]  ;;  %v3572_v33 = vmov 1   ;;  %v3576_v34 = vmov 2  }
  0x14   :  { %v2008_v15 = vld [vmem:[%s3567_s0 + $0x78] sm:$0xff]  ;;  %v2013_v16 = vld [vmem:[%s3567_s0 + $0x70] sm:$0xff]  ;;  %v2020_v17 = vld [vmem:[%s3567_s0 + $0x88] sm:$0xff]  ;;  %v3574_v40 = vmov 3  }
  0x15   :  { %v2025_v18 = vld [vmem:[%s3567_s0 + $0x80] sm:$0xff]  ;;  %v2032_v19 = vld [vmem:[%s3567_s0 + $0x98] sm:$0xff]  ;;  %v2037_v20 = vld [vmem:[%s3567_s0 + $0x90] sm:$0xff] }
  0x16   :  { %84 = vperm.xlu1 %1784, %v1982_v11   ;;  %81 = vperm.xlu0 %1783, %v1987_v12   ;;  %v2044_v21 = vld [vmem:[%s3567_s0 + $0xa8] sm:$0xff]  ;;  %v2049_v22 = vld [vmem:[%s3567_s0 + $0xa0] sm:$0xff]  ;;  %v2056_v23 = vld [vmem:[%s3567_s0 + $0xb8] sm:$0xff] }
  0x17   :  { %v2061_v24 = vld [vmem:[%s3567_s0 + $0xb0] sm:$0xff]  ;;  %v2068_v25 = vld [vmem:[%s3567_s0 + $0xc8] sm:$0xff]  ;;  %v2073_v26 = vld [vmem:[%s3567_s0 + $0xc0] sm:$0xff] }
  0x18   :  { %v2080_v27 = vld [vmem:[%s3567_s0 + $0xd8] sm:$0xff]  ;;  %v2085_v28 = vld [vmem:[%s3567_s0 + $0xd0] sm:$0xff]  ;;  %v2092_v29 = vld [vmem:[%s3567_s0 + $0xe8] sm:$0xff] }
  0x19   :  { %v2097_v30 = vld [vmem:[%s3567_s0 + $0xe0] sm:$0xff]  ;;  %v2104_v31 = vld [vmem:[%s3567_s0 + $0xf8] sm:$0xff]  ;;  %v45_v32 = vld [vmem:[%s3567_s0 + $0xf0] sm:$0xff] }
  0x1a   :  { %90 = vperm.xlu1 %1784, %v1996_v13   ;;  %87 = vperm.xlu0 %1783, %v2001_v14   ;;  %v1814_v35 = vld [vmem:[%s3568_s1 + $0x4] ss:$8 sps:$4 sm:$0xff]   ;;  %v1816_v36 = vld [vmem:[%s3568_s1] ss:$8 sps:$4 sm:$0xff]   ;;  %v1817_v37 = vld [vmem:[%s3568_s1 + $0x14] ss:$8 sps:$4 sm:$0xff]  }
  0x1b   :  { %1438 = vmatprep.subr.bf16.mxu0 %v1814_v35  ;;  %1743 = vmatprep.subr.bf16.mxu1 %v1814_v35  ;;  %v1819_v38 = vld [vmem:[%s3568_s1 + $0x10] ss:$8 sps:$4 sm:$0xff]   ;;  %v1820_v39 = vld [vmem:[%s3568_s1 + $0x24] ss:$8 sps:$4 sm:$0xff]   ;;  %v1822_v41 = vld [vmem:[%s3568_s1 + $0x20] ss:$8 sps:$4 sm:$0xff]  }
  0x1c   :  { %1439 = vmatpush1.bf16.msra.mxu0 %v1816_v36  ;;  %1759 = vmatpush1.bf16.msra.mxu1 %v1816_v36  ;;  %v1823_v42 = vld [vmem:[%s3568_s1 + $0x34] ss:$8 sps:$4 sm:$0xff]   ;;  %v1825_v43 = vld [vmem:[%s3568_s1 + $0x30] ss:$8 sps:$4 sm:$0xff]   ;;  %v1826_v44 = vld [vmem:[%s3568_s1 + $0x44] ss:$8 sps:$4 sm:$0xff]  }
  0x1d   :  { %1440 = vmatprep.subr.bf16.mxu0 %v1817_v37  ;;  %1744 = vmatprep.subr.bf16.mxu1 %v1817_v37  ;;  %v1828_v45 = vld [vmem:[%s3568_s1 + $0x40] ss:$8 sps:$4 sm:$0xff]   ;;  %v1829_v46 = vld [vmem:[%s3568_s1 + $0x54] ss:$8 sps:$4 sm:$0xff]   ;;  %v1831_v47 = vld [vmem:[%s3568_s1 + $0x50] ss:$8 sps:$4 sm:$0xff]  }
  0x1e   :  { %96 = vperm.xlu1 %1784, %v2008_v15   ;;  %93 = vperm.xlu0 %1783, %v2013_v16   ;;  %v1832_v48 = vld [vmem:[%s3568_s1 + $0x64] ss:$8 sps:$4 sm:$0xff]   ;;  %v1834_v49 = vld [vmem:[%s3568_s1 + $0x60] ss:$8 sps:$4 sm:$0xff]   ;;  %v1835_v50 = vld [vmem:[%s3568_s1 + $0x74] ss:$8 sps:$4 sm:$0xff]  }
  0x1f   :  { %v1837_v51 = vld [vmem:[%s3568_s1 + $0x70] ss:$8 sps:$4 sm:$0xff]   ;;  %v1838_v52 = vld [vmem:[%s3568_s1 + $0x84] ss:$8 sps:$4 sm:$0xff]   ;;  %v1840_v53 = vld [vmem:[%s3568_s1 + $0x80] ss:$8 sps:$4 sm:$0xff]  }
  0x20   :  { %1441 = vmatpush1.bf16.msra.mxu0 %v1819_v38  ;;  %1760 = vmatpush1.bf16.msra.mxu1 %v1819_v38  ;;  %v1841_v54 = vld [vmem:[%s3568_s1 + $0x94] ss:$8 sps:$4 sm:$0xff]   ;;  %v1843_v55 = vld [vmem:[%s3568_s1 + $0x90] ss:$8 sps:$4 sm:$0xff]   ;;  %v1844_v56 = vld [vmem:[%s3568_s1 + $0xa4] ss:$8 sps:$4 sm:$0xff]  }
  0x21   :  { %1442 = vmatprep.subr.bf16.mxu0 %v1820_v39  ;;  %1745 = vmatprep.subr.bf16.mxu1 %v1820_v39  ;;  %v1846_v57 = vld [vmem:[%s3568_s1 + $0xa0] ss:$8 sps:$4 sm:$0xff]   ;;  %v1847_v58 = vld [vmem:[%s3568_s1 + $0xb4] ss:$8 sps:$4 sm:$0xff]   ;;  %v1849_v59 = vld [vmem:[%s3568_s1 + $0xb0] ss:$8 sps:$4 sm:$0xff]  }
  0x22   :  { %102 = vperm.xlu1 %1784, %v2020_v17   ;;  %99 = vperm.xlu0 %1783, %v2025_v18   ;;  %v1850_v60 = vld [vmem:[%s3568_s1 + $0xc4] ss:$8 sps:$4 sm:$0xff]   ;;  %v1852_v61 = vld [vmem:[%s3568_s1 + $0xc0] ss:$8 sps:$4 sm:$0xff]   ;;  %v1855_v2 = vld [vmem:[%s3568_s1 + $0xd0] ss:$8 sps:$4 sm:$0xff]  }
  0x23   :  { %v1859_v36 = vld [vmem:[%s3568_s1 + $0xf4] ss:$8 sps:$4 sm:$0xff]   ;;  %v1861_v37 = vld [vmem:[%s3568_s1 + $0xf0] ss:$8 sps:$4 sm:$0xff]  }
  0x24   :  { %1443 = vmatpush1.bf16.msra.mxu0 %v1822_v41  ;;  %1761 = vmatpush1.bf16.msra.mxu1 %v1822_v41 }
  0x25   :  { %1444 = vmatprep.subr.bf16.mxu0 %v1823_v42  ;;  %1746 = vmatprep.subr.bf16.mxu1 %v1823_v42 }
  0x26   :  { %108 = vperm.xlu1 %1784, %v2032_v19   ;;  %105 = vperm.xlu0 %1783, %v2037_v20  }
  0x28   :  { %1445 = vmatpush1.bf16.msra.mxu0 %v1825_v43  ;;  %1762 = vmatpush1.bf16.msra.mxu1 %v1825_v43 }
  0x29   :  { %1446 = vmatprep.subr.bf16.mxu0 %v1826_v44  ;;  %1747 = vmatprep.subr.bf16.mxu1 %v1826_v44 }
  0x2a   :  { %114 = vperm.xlu1 %1784, %v2044_v21   ;;  %111 = vperm.xlu0 %1783, %v2049_v22  }
  0x2c   :  { %1447 = vmatpush1.bf16.msra.mxu0 %v1828_v45  ;;  %1763 = vmatpush1.bf16.msra.mxu1 %v1828_v45 }
  0x2d   :  { %1448 = vmatprep.subr.bf16.mxu0 %v1829_v46  ;;  %1748 = vmatprep.subr.bf16.mxu1 %v1829_v46 }
  0x2e   :  { %120 = vperm.xlu1 %1784, %v2056_v23   ;;  %117 = vperm.xlu0 %1783, %v2061_v24  }
  0x30   :  { %1449 = vmatpush1.bf16.msra.mxu0 %v1831_v47  ;;  %1764 = vmatpush1.bf16.msra.mxu1 %v1831_v47 }
  0x31   :  { %1450 = vmatprep.subr.bf16.mxu0 %v1832_v48  ;;  %1749 = vmatprep.subr.bf16.mxu1 %v1832_v48 }
  0x32   :  { %126 = vperm.xlu1 %1784, %v2068_v25   ;;  %123 = vperm.xlu0 %1783, %v2073_v26  }
  0x34   :  { %1451 = vmatpush1.bf16.msra.mxu0 %v1834_v49  ;;  %1765 = vmatpush1.bf16.msra.mxu1 %v1834_v49 }
  0x35   :  { %1452 = vmatprep.subr.bf16.mxu0 %v1835_v50  ;;  %1750 = vmatprep.subr.bf16.mxu1 %v1835_v50 }
  0x36   :  { %132 = vperm.xlu1 %1784, %v2080_v27   ;;  %129 = vperm.xlu0 %1783, %v2085_v28  }
  0x38   :  { %1453 = vmatpush1.bf16.msra.mxu0 %v1837_v51  ;;  %1766 = vmatpush1.bf16.msra.mxu1 %v1837_v51 }
  0x39   :  { %1454 = vmatprep.subr.bf16.mxu0 %v1838_v52  ;;  %1751 = vmatprep.subr.bf16.mxu1 %v1838_v52 }
  0x3a   :  { %138 = vperm.xlu1 %1784, %v2092_v29   ;;  %135 = vperm.xlu0 %1783, %v2097_v30  }
  0x3c   :  { %1455 = vmatpush1.bf16.msra.mxu0 %v1840_v53  ;;  %1767 = vmatpush1.bf16.msra.mxu1 %v1840_v53 }
  0x3d   :  { %1456 = vmatprep.subr.bf16.mxu0 %v1841_v54  ;;  %1752 = vmatprep.subr.bf16.mxu1 %v1841_v54 }
  0x3e   :  { %144 = vperm.xlu1 %1784, %v2104_v31   ;;  %141 = vperm.xlu0 %1783, %v45_v32   ;;  %v1858_v32 = vld [vmem:[%s3568_s1 + $0xe0] ss:$8 sps:$4 sm:$0xff]  }
  0x40   :  { %1457 = vmatpush1.bf16.msra.mxu0 %v1843_v55  ;;  %1768 = vmatpush1.bf16.msra.mxu1 %v1843_v55 }
  0x41   :  { %1458 = vmatprep.subr.bf16.mxu0 %v1844_v56  ;;  %1753 = vmatprep.subr.bf16.mxu1 %v1844_v56 }
  0x42   :  { %1785 = vset.pattern.permute.xlu1 %v3572_v33  ;;  %1786 = vset.pattern.permute.xlu0 %v3576_v34 }
  0x43   :  { %342 = vperm.xlu1 %1785, %v1941_v4   ;;  %627 = vperm.xlu0 %1786, %v1929_v1  }
  0x44   :  { %1459 = vmatpush1.bf16.msra.mxu0 %v1846_v57  ;;  %1769 = vmatpush1.bf16.msra.mxu1 %v1846_v57 }
  0x45   :  { %1460 = vmatprep.subr.bf16.mxu0 %v1847_v58  ;;  %1754 = vmatprep.subr.bf16.mxu1 %v1847_v58 }
  0x47   :  { %345 = vperm.xlu1 %1785, %v1924_v0   ;;  %678 = vperm.xlu0 %1786, %v2020_v17  }
  0x48   :  { %1461 = vmatpush1.bf16.msra.mxu0 %v1849_v59  ;;  %1770 = vmatpush1.bf16.msra.mxu1 %v1849_v59 }
  0x49   :  { %1462 = vmatprep.subr.bf16.mxu0 %v1850_v60  ;;  %1755 = vmatprep.subr.bf16.mxu1 %v1850_v60 }
  0x4b   :  { %351 = vperm.xlu1 %1785, %v1953_v6   ;;  %636 = vperm.xlu0 %1786, %v1936_v3  }
  0x4c   :  { %1463 = vmatpush1.bf16.msra.mxu0 %v1852_v61  ;;  %1771 = vmatpush1.bf16.msra.mxu1 %v1852_v61 }
  0x4f   :  { %357 = vperm.xlu1 %1785, %v1965_v8   ;;  %687 = vperm.xlu0 %1786, %v2049_v22  }
  0x53   :  { %363 = vperm.xlu1 %1785, %v1975_v10   ;;  %648 = vperm.xlu0 %1786, %v1960_v7  }
  0x57   :  { %390 = vperm.xlu1 %1785, %v2020_v17   ;;  %1797 = vset.pattern.permute.xlu0 %v3574_v40 }
  0x58   :  { %918 = vperm.xlu0 %1797, %v1941_v4  }
  0x5b   :  { %1787 = vset.pattern.permute.xlu1 %v3576_v34 }
  0x5c   :  { %630 = vperm.xlu1 %1787, %v1941_v4   ;;  %921 = vperm.xlu0 %1797, %v1924_v0  }
  0x60   :  { %675 = vperm.xlu1 %1787, %v2025_v18   ;;  %972 = vperm.xlu0 %1797, %v2032_v19  }
  0x64   :  { %1788 = vset.pattern.permute.xlu1 %v3574_v40  ;;  %930 = vperm.xlu0 %1797, %v1948_v5  }
  0x65   :  { %915 = vperm.xlu1 %1788, %v1929_v1  }
  0x68   :  { %933 = vperm.xlu0 %1797, %v1965_v8  }
  0x69   :  { %963 = vperm.xlu1 %1788, %v2025_v18  }
  0x6c   :  { %984 = vperm.xlu0 %1797, %v2056_v23  }
  0x6d   :  { %966 = vperm.xlu1 %1788, %v2020_v17  }
  0x70   :  { %939 = vperm.xlu0 %1797, %v1975_v10  }
  0x71   :  { %1789 = vset.pattern.permute.xlu1 %v3572_v33 }
  0x72   :  { %396 = vperm.xlu1 %1789, %v2032_v19  }
  0x74   :  { %990 = vperm.xlu0 %1797, %v2068_v25  }
  0x76   :  { %1790 = vset.pattern.permute.xlu1 %v3576_v34 }
  0x77   :  { %633 = vperm.xlu1 %1790, %v1924_v0   ;;  %v1853_v0 = vld [vmem:[%s3568_s1 + $0xd4] ss:$8 sps:$4 sm:$0xff]  }
  0x78   :  { %948 = vperm.xlu0 %1797, %v1982_v11   ;;  %1464 = vmatprep.subr.bf16.mxu0 %v1853_v0 }
  0x79   :  { %1465 = vmatpush1.bf16.msra.mxu0 %v1855_v2  ;;  %1756 = vmatprep.subr.bf16.mxu1 %v1853_v0 }
  0x7a   :  { %1772 = vmatpush1.bf16.msra.mxu1 %v1855_v2 }
  0x7b   :  { %681 = vperm.xlu1 %1790, %v2037_v20  }
  0x7c   :  { %951 = vperm.xlu0 %1797, %v2001_v14  }
  0x7f   :  { %684 = vperm.xlu1 %1790, %v2032_v19   ;;  %v1856_v19 = vld [vmem:[%s3568_s1 + $0xe4] ss:$8 sps:$4 sm:$0xff]  }
  0x80   :  { %1002 = vperm.xlu0 %1797, %v2092_v29   ;;  %1466 = vmatprep.subr.bf16.mxu0 %v1856_v19 }
  0x81   :  { %v2226_v62 = vpop.permute.xlu1 %57  ;;  %v2228_v63 = vpop.permute.xlu0 %51  ;;  %1467 = vmatpush1.bf16.msra.mxu0 %v1858_v32  ;;  %1757 = vmatprep.subr.bf16.mxu1 %v1856_v19  ;;  %v3571_v19 = vlaneseq }
  0x82   :  { %1468 = vmatprep.subr.bf16.mxu0 %v1859_v36  ;;  %1773 = vmatpush1.bf16.msra.mxu1 %v1858_v32 }
  0x83   :  { %1791 = vset.pattern.permute.xlu1 %v3574_v40  ;;  %1758 = vmatprep.subr.bf16.mxu1 %v1859_v36  ;;  %v2389_v32 = vand.u32 127, %v3571_v19 }
  0x84   :  { %924 = vperm.xlu1 %1791, %v1936_v3   ;;  %1808 = vset.pattern.permute.xlu0 %v3572_v33 }
  0x85   :  { %v2239_v4 = vpop.permute.xlu1 %60  ;;  %339 = vperm.xlu0 %1808, %v1929_v1   ;;  %v2242_v17 = vpop.permute.xlu0 %54  ;;  %1469 = vmatpush1.bf16.msra.mxu0 %v1861_v37  ;;  %vm150_vm0 = vcmp.eq.s32.totalorder %v2226_v62, %v2389_v32  ;;  %vm146_vm2 = vcmp.eq.s32.totalorder %v2228_v63, %v2389_v32 }
  0x86   :  { %1774 = vmatpush1.bf16.msra.mxu1 %v1861_v37  ;;  %v2398_v37 = vadd.s32 128, %v2389_v32  ;;  %vm152_vm4 = vcmp.eq.s32.totalorder %v2239_v4, %v2389_v32  ;;  %vm148_vm6 = vcmp.eq.s32.totalorder %v2242_v17, %v2389_v32 }
  0x88   :  { %969 = vperm.xlu1 %1791, %v2037_v20   ;;  %vm151_vm1 = vcmp.eq.s32.totalorder %v2226_v62, %v2398_v37  ;;  %vm147_vm3 = vcmp.eq.s32.totalorder %v2228_v63, %v2398_v37  ;;  %vm153_vm5 = vcmp.eq.s32.totalorder %v2239_v4, %v2398_v37  ;;  %vm149_vm7 = vcmp.eq.s32.totalorder %v2242_v17, %v2398_v37 }
  0x89   :  { %v2251_v35 = vpop.permute.xlu1 %66  ;;  %348 = vperm.xlu0 %1808, %v1936_v3   ;;  %v2254_v1 = vpop.permute.xlu0 %63 }
  0x8a   :  { %vm156_vm8 = vcmp.eq.s32.totalorder %v2251_v35, %v2389_v32  ;;  %vm157_vm9 = vcmp.eq.s32.totalorder %v2251_v35, %v2398_v37  ;;  %vm154_vm10 = vcmp.eq.s32.totalorder %v2254_v1, %v2389_v32  ;;  %vm155_vm11 = vcmp.eq.s32.totalorder %v2254_v1, %v2398_v37 }
  0x8c   :  { %1792 = vset.pattern.permute.xlu1 %v3572_v33 }
  0x8d   :  { %v2263_v38 = vpop.permute.xlu1 %72  ;;  %399 = vperm.xlu1 %1792, %v2049_v22   ;;  %354 = vperm.xlu0 %1808, %v1948_v5   ;;  %v2267_v3 = vpop.permute.xlu0 %69 }
  0x8e   :  { %3610 = vst [vmem:[#allocation5_spill] sm:$0xff] %v2263_v38  ;;  %3611 = vst [vmem:[#allocation6_spill] sm:$0xff] %v2267_v3  ;;  %v3646_v3 = vmov 1  }
  0x91   :  { %v2269_v39 = vpop.permute.xlu1 %78  ;;  %1793 = vset.pattern.permute.xlu1 %v3576_v34  ;;  %360 = vperm.xlu0 %1808, %v1960_v7   ;;  %v2273_v41 = vpop.permute.xlu0 %75 }
  0x92   :  { %3612 = vst [vmem:[#allocation7_spill] sm:$0xff] %v2269_v39  ;;  %3613 = vst [vmem:[#allocation8_spill] sm:$0xff] %v2273_v41  ;;  %639 = vperm.xlu1 %1793, %v1953_v6   ;;  %v3637_v39 = vmov 2  }
  0x95   :  { %v2276_v42 = vpop.permute.xlu1 %84  ;;  %387 = vperm.xlu0 %1808, %v2025_v18   ;;  %v2279_v43 = vpop.permute.xlu0 %81 }
  0x96   :  { %3614 = vst [vmem:[#allocation9_spill] sm:$0xff] %v2276_v42  ;;  %3615 = vst [vmem:[#allocation10_spill] sm:$0xff] %v2279_v43  ;;  %642 = vperm.xlu1 %1793, %v1948_v5  }
  0x99   :  { %v2282_v44 = vpop.permute.xlu1 %90  ;;  %393 = vperm.xlu0 %1808, %v2037_v20   ;;  %v2285_v45 = vpop.permute.xlu0 %87 }
  0x9a   :  { %3616 = vst [vmem:[#allocation11_spill] sm:$0xff] %v2282_v44  ;;  %3617 = vst [vmem:[#allocation12_spill] sm:$0xff] %v2285_v45  ;;  %690 = vperm.xlu1 %1793, %v2044_v21  }
  0x9d   :  { %v2288_v46 = vpop.permute.xlu1 %96  ;;  %402 = vperm.xlu0 %1808, %v2044_v21   ;;  %v2291_v47 = vpop.permute.xlu0 %93 }
  0x9e   :  { %3618 = vst [vmem:[#allocation13_spill] sm:$0xff] %v2288_v46  ;;  %3619 = vst [vmem:[#allocation14_spill] sm:$0xff] %v2291_v47  ;;  %1794 = vset.pattern.permute.xlu1 %v3574_v40 }
  0x9f   :  { %927 = vperm.xlu1 %1794, %v1953_v6  }
  0xa1   :  { %v2295_v18 = vpop.permute.xlu1 %102  ;;  %405 = vperm.xlu0 %1808, %v2061_v24   ;;  %v2298_v5 = vpop.permute.xlu0 %99 }
  0xa2   :  { %vm180_vm12 = vcmp.eq.s32.totalorder %v2295_v18, %v2389_v32  ;;  %vm181_vm13 = vcmp.eq.s32.totalorder %v2295_v18, %v2398_v37  ;;  %vm178_vm14 = vcmp.eq.s32.totalorder %v2298_v5, %v2389_v32  ;;  %vm179_vm15 = vcmp.eq.s32.totalorder %v2298_v5, %v2398_v37 }
  0xa3   :  { %975 = vperm.xlu1 %1794, %v2049_v22  }
  0xa5   :  { %v2301_v20 = vpop.permute.xlu1 %108  ;;  %411 = vperm.xlu0 %1808, %v2073_v26   ;;  %v2304_v48 = vpop.permute.xlu0 %105 }
  0xa7   :  { %978 = vperm.xlu1 %1794, %v2044_v21  }
  0xa9   :  { %v2307_v49 = vpop.permute.xlu1 %114  ;;  %372 = vperm.xlu0 %1808, %v1982_v11   ;;  %v2310_v6 = vpop.permute.xlu0 %111 }
  0xab   :  { %1795 = vset.pattern.permute.xlu1 %v3572_v33 }
  0xac   :  { %408 = vperm.xlu1 %1795, %v2056_v23  }
  0xad   :  { %v2314_v50 = vpop.permute.xlu1 %120  ;;  %375 = vperm.xlu0 %1808, %v2001_v14   ;;  %v2317_v22 = vpop.permute.xlu0 %117 }
  0xae   :  { %3620 = vst [vmem:[#allocation15_spill] sm:$0xff] %v2314_v50  ;;  %3621 = vst [vmem:[#allocation16_spill] sm:$0xff] %v2317_v22 }
  0xb0   :  { %1796 = vset.pattern.permute.xlu1 %v3576_v34 }
  0xb1   :  { %v2320_v51 = vpop.permute.xlu1 %126  ;;  %645 = vperm.xlu1 %1796, %v1965_v8   ;;  %426 = vperm.xlu0 %1808, %v2092_v29   ;;  %v2324_v21 = vpop.permute.xlu0 %123 }
  0xb2   :  { %3622 = vst [vmem:[#allocation17_spill] sm:$0xff] %v2320_v51  ;;  %3623 = vst [vmem:[#allocation18_spill] sm:$0xff] %v2324_v21 }
  0xb5   :  { %v2326_v52 = vpop.permute.xlu1 %132  ;;  %693 = vperm.xlu1 %1796, %v2061_v24   ;;  %384 = vperm.xlu0 %1808, %v2008_v15   ;;  %v2330_v53 = vpop.permute.xlu0 %129 }
  0xb6   :  { %3624 = vst [vmem:[#allocation19_spill] sm:$0xff] %v2326_v52  ;;  %3625 = vst [vmem:[#allocation20_spill] sm:$0xff] %v2330_v53 }
  0xb9   :  { %v2332_v54 = vpop.permute.xlu1 %138  ;;  %696 = vperm.xlu1 %1796, %v2056_v23   ;;  %v2335_v55 = vpop.permute.xlu0 %135  ;;  %1810 = vset.pattern.permute.xlu0 %v3576_v34 }
  0xba   :  { %3626 = vst [vmem:[#allocation21_spill] sm:$0xff] %v2332_v54  ;;  %3627 = vst [vmem:[#allocation22_spill] sm:$0xff] %v2335_v55  ;;  %654 = vperm.xlu0 %1810, %v1970_v9  }
  0xbd   :  { %v2339_v8 = vpop.permute.xlu1 %144  ;;  %1798 = vset.pattern.permute.xlu1 %v3574_v40  ;;  %v2342_v29 = vpop.permute.xlu0 %141 }
  0xbe   :  { %3628 = vst [vmem:[#allocation23_spill] sm:$0xff] %v2339_v8  ;;  %3629 = vst [vmem:[#allocation24_spill] sm:$0xff] %v2342_v29  ;;  %936 = vperm.xlu1 %1798, %v1960_v7   ;;  %657 = vperm.xlu0 %1810, %v1987_v12  }
  0xc2   :  { %v2346_v56 = vpop.permute.xlu1 %342  ;;  %981 = vperm.xlu1 %1798, %v2061_v24   ;;  %v2349_v23 = vpop.permute.xlu0 %627  ;;  %708 = vperm.xlu0 %1810, %v2080_v27  }
  0xc6   :  { %v2352_v57 = vpop.permute.xlu1 %345  ;;  %1799 = vset.pattern.permute.xlu1 %v3572_v33  ;;  %v2355_v58 = vpop.permute.xlu0 %678  ;;  %666 = vperm.xlu0 %1810, %v1996_v13  }
  0xc7   :  { %366 = vperm.xlu1 %1799, %v1970_v9  }
  0xca   :  { %v2359_v7 = vpop.permute.xlu1 %351  ;;  %v2361_v59 = vpop.permute.xlu0 %636  ;;  %669 = vperm.xlu0 %1810, %v2013_v16  }
  0xcb   :  { %414 = vperm.xlu1 %1799, %v2068_v25  }
  0xce   :  { %v2365_v24 = vpop.permute.xlu1 %357  ;;  %v2367_v60 = vpop.permute.xlu0 %687  ;;  %720 = vperm.xlu0 %1810, %v2104_v31  }
  0xcf   :  { %3630 = vst [vmem:[#allocation25_spill] sm:$0xff] %v2365_v24  ;;  %1800 = vset.pattern.permute.xlu1 %v3576_v34 }
  0xd0   :  { %651 = vperm.xlu1 %1800, %v1975_v10  }
  0xd2   :  { %v2372_v61 = vpop.permute.xlu1 %363  ;;  %v2374_v0 = vpop.permute.xlu0 %648  ;;  %1813 = vset.pattern.permute.xlu0 %v3574_v40 }
  0xd3   :  { %3631 = vst [vmem:[#allocation26_spill] sm:$0xff] %v2372_v61  ;;  %3632 = vst [vmem:[#allocation27_spill] sm:$0xff] %v2374_v0  ;;  %960 = vperm.xlu0 %1813, %v2008_v15  }
  0xd4   :  { %699 = vperm.xlu1 %1800, %v2073_v26  }
  0xd6   :  { %v2379_v16 = vpop.permute.xlu1 %390 }
  0xd7   :  { %v2381_v2 = vpop.permute.xlu0 %918 }
  0xd8   :  { %702 = vperm.xlu1 %1800, %v2068_v25  }
  0xdb   :  { %v2384_v10 = vpop.permute.xlu1 %630  ;;  %v2386_v31 = vpop.permute.xlu0 %921 }
  0xdc   :  { %1801 = vset.pattern.permute.xlu1 %v3574_v40 }
  0xdd   :  { %942 = vperm.xlu1 %1801, %v1970_v9   ;;  %v3601_v9 = vmov 0.0  }
  0xde   :  { %v2421_v62 = vsel %vm151_vm1, 1.0, %v3601_v9  ;;  %v2433_v40 = vsel %vm147_vm3, 1.0, %v3601_v9  ;;  %v2442_v4 = vsel %vm152_vm4, 1.0, %v3601_v9  ;;  %v2451_v29 = vsel %vm153_vm5, 1.0, %v3601_v9 }
  0xdf   :  { %v2393_v36 = vpop.permute.xlu1 %675  ;;  %v2395_v15 = vpop.permute.xlu0 %972  ;;  %v212_v17 = vsel %vm148_vm6, 1.0, %v3601_v9  ;;  %v213_v35 = vsel %vm149_vm7, 1.0, %v3601_v9  ;;  %v2461_v8 = vsel %vm156_vm8, 1.0, %v3601_v9  ;;  %v2470_v47 = vsel %vm157_vm9, 1.0, %v3601_v9 }
  0xe0   :  { %v2473_v18 = vsel %vm154_vm10, 1.0, %v3601_v9  ;;  %v2476_v46 = vsel %vm155_vm11, 1.0, %v3601_v9  ;;  %v244_v54 = vsel %vm180_vm12, 1.0, %v3601_v9  ;;  %v245_v5 = vsel %vm181_vm13, 1.0, %v3601_v9 }
  0xe1   :  { %987 = vperm.xlu1 %1801, %v2073_v26   ;;  %v2418_v26 = vsel %vm150_vm0, 1.0, %v3601_v9  ;;  %vm184_vm0 = vcmp.eq.s32.totalorder %v2301_v20, %v2389_v32  ;;  %vm185_vm1 = vcmp.eq.s32.totalorder %v2301_v20, %v2398_v37  ;;  %v2489_v44 = vsel %vm178_vm14, 1.0, %v3601_v9 }
  0xe2   :  { %v2492_v53 = vsel %vm179_vm15, 1.0, %v3601_v9  ;;  %vm183_vm3 = vcmp.eq.s32.totalorder %v2304_v48, %v2398_v37  ;;  %vm189_vm4 = vcmp.eq.s32.totalorder %v2307_v49, %v2398_v37  ;;  %v2500_v52 = vsel %vm184_vm0, 1.0, %v3601_v9 }
  0xe3   :  { %v2401_v25 = vpop.permute.xlu0 %930  ;;  %vm186_vm5 = vcmp.eq.s32.totalorder %v2310_v6, %v2389_v32  ;;  %vm187_vm6 = vcmp.eq.s32.totalorder %v2310_v6, %v2398_v37  ;;  %vm436_vm7 = vcmp.eq.s32.totalorder %v2346_v56, %v2389_v32  ;;  %vm437_vm8 = vcmp.eq.s32.totalorder %v2346_v56, %v2398_v37 }
  0xe4   :  { %v2407_v19 = vpop.permute.xlu1 %915  ;;  %vm722_vm9 = vcmp.eq.s32.totalorder %v2349_v23, %v2389_v32  ;;  %v2521_v42 = vsel %vm183_vm3, 1.0, %v3601_v9  ;;  %v2524_v6 = vsel %vm189_vm4, 1.0, %v3601_v9  ;;  %vm438_vm10 = vcmp.eq.s32.totalorder %v2352_v57, %v2389_v32 }
  0xe5   :  { %1802 = vset.pattern.permute.xlu1 %v3572_v33  ;;  %v2430_v33 = vsel %vm146_vm2, 1.0, %v3601_v9  ;;  %vm182_vm2 = vcmp.eq.s32.totalorder %v2304_v48, %v2389_v32  ;;  %v2511_v48 = vsel %vm185_vm1, 1.0, %v3601_v9  ;;  %3636 = vst [vmem:[#allocation31_spill] sm:$0xff] %v2524_v6  ;;  %vm439_vm11 = vcmp.eq.s32.totalorder %v2352_v57, %v2398_v37 }
  0xe6   :  { %369 = vperm.xlu1 %1802, %v1987_v12   ;;  %v2514_v43 = vsel %vm182_vm2, 1.0, %v3601_v9  ;;  %v2533_v51 = vsel %vm186_vm5, 1.0, %v3601_v9  ;;  %v2536_v56 = vsel %vm187_vm6, 1.0, %v3601_v9  ;;  %vm723_vm12 = vcmp.eq.s32.totalorder %v2349_v23, %v2398_v37 }
  0xe7   :  { %v2427_v63 = vpop.permute.xlu0 %933  ;;  %v501_v61 = vsel %vm437_vm8, 1.0, %v3601_v9  ;;  %v2544_v41 = vsel %vm722_vm9, 1.0, %v3601_v9  ;;  %vm756_vm13 = vcmp.eq.s32.totalorder %v2355_v58, %v2389_v32  ;;  %vm757_vm14 = vcmp.eq.s32.totalorder %v2355_v58, %v2398_v37 }
  0xe8   :  { %3633 = vst [vmem:[#allocation28_spill] sm:$0xff] %v2427_v63  ;;  %v2439_v34 = vpop.permute.xlu1 %963  ;;  %v503_v23 = vsel %vm439_vm11, 1.0, %v3601_v9  ;;  %vm468_vm15 = vcmp.eq.s32.totalorder %v2379_v16, %v2389_v32  ;;  %vm469_vm0 = vcmp.eq.s32.totalorder %v2379_v16, %v2398_v37  ;;  %v2560_v22 = vsel %vm723_vm12, 1.0, %v3601_v9 }
  0xe9   :  { %vm442_vm1 = vcmp.eq.s32.totalorder %v2359_v7, %v2389_v32  ;;  %vm443_vm2 = vcmp.eq.s32.totalorder %v2359_v7, %v2398_v37  ;;  %v820_v58 = vsel %vm756_vm13, 1.0, %v3601_v9  ;;  %vm728_vm3 = vcmp.eq.s32.totalorder %v2361_v59, %v2389_v32 }
  0xea   :  { %417 = vperm.xlu1 %1802, %v2085_v28   ;;  %v533_v7 = vsel %vm469_vm0, 1.0, %v3601_v9  ;;  %v507_v38 = vsel %vm443_vm2, 1.0, %v3601_v9  ;;  %vm729_vm4 = vcmp.eq.s32.totalorder %v2361_v59, %v2398_v37  ;;  %vm725_vm5 = vcmp.eq.s32.totalorder %v2384_v10, %v2398_v37 }
  0xeb   :  { %v2467_v1 = vpop.permute.xlu0 %984  ;;  %vm762_vm6 = vcmp.eq.s32.totalorder %v2367_v60, %v2389_v32  ;;  %vm724_vm8 = vcmp.eq.s32.totalorder %v2384_v10, %v2389_v32  ;;  %vm1012_vm9 = vcmp.eq.s32.totalorder %v2381_v2, %v2389_v32  ;;  %v3641_v10 = vmov 3  }
  0xec   :  { %3634 = vst [vmem:[#allocation29_spill] sm:$0xff] %v2467_v1  ;;  %v2480_v55 = vpop.permute.xlu1 %966  ;;  %v502_v1 = vsel %vm438_vm10, 1.0, %v3601_v9  ;;  %vm1013_vm10 = vcmp.eq.s32.totalorder %v2381_v2, %v2398_v37  ;;  %vm1014_vm11 = vcmp.eq.s32.totalorder %v2386_v31, %v2389_v32  ;;  %vm1015_vm12 = vcmp.eq.s32.totalorder %v2386_v31, %v2398_v37 }
  0xed   :  { %v2573_v16 = vadd.f32 %v502_v1, %v2418_v26  ;;  %v2590_v26 = vsel %vm728_vm3, 1.0, %v3601_v9  ;;  %v597_v1 = vadd.f32 %v533_v7, %v245_v5  ;;  %vm754_vm13 = vcmp.eq.s32.totalorder %v2393_v36, %v2389_v32 }
  0xee   :  { %420 = vperm.xlu1 %1802, %v2080_v27   ;;  %vm1049_vm0 = vcmp.eq.s32.totalorder %v2395_v15, %v2398_v37  ;;  %vm1021_vm2 = vcmp.eq.s32.totalorder %v2401_v25, %v2398_v37  ;;  %vm1011_vm3 = vcmp.eq.s32.totalorder %v2407_v19, %v2398_v37 }
  0xef   :  { %v2508_v20 = vpop.permute.xlu0 %939 }
  0xf0   :  { %3635 = vst [vmem:[#allocation30_spill] sm:$0xff] %v2508_v20  ;;  %v500_v20 = vsel %vm436_vm7, 1.0, %v3601_v9  ;;  %vm763_vm7 = vcmp.eq.s32.totalorder %v2367_v60, %v2398_v37  ;;  %v3640_v60 = vmov 0.0  }
  0xf1   :  { %v2530_v21 = vpop.permute.xlu1 %396  ;;  %v564_v0 = vadd.f32 %v500_v20, %v212_v17  ;;  %v2576_v17 = vadd.f32 %v503_v23, %v2421_v62  ;;  %v532_v20 = vsel %vm468_vm15, 1.0, %v3601_v9  ;;  %v2621_v2 = vsel %vm763_vm7, 1.0, %v3640_v60 }
  0xf2   :  { %1803 = vset.pattern.permute.xlu1 %v3637_v39  ;;  %v596_v62 = vadd.f32 %v532_v20, %v244_v54  ;;  %v789_v54 = vsel %vm725_vm5, 1.0, %v3640_v60  ;;  %v2618_v20 = vsel %vm762_vm6, 1.0, %v3640_v60  ;;  %vm1048_vm15 = vcmp.eq.s32.totalorder %v2395_v15, %v2389_v32 }
  0xf3   :  { %660 = vperm.xlu1 %1803, %v1982_v11   ;;  %v2551_v57 = vpop.permute.xlu0 %990  ;;  %v565_v11 = vadd.f32 %v501_v61, %v213_v35  ;;  %v506_v35 = vsel %vm442_vm1, 1.0, %v3601_v9  ;;  %v2647_v45 = vsel %vm1015_vm12, 1.0, %v3640_v60  ;;  %vm1010_vm1 = vcmp.eq.s32.totalorder %v2407_v19, %v2389_v32 }
  0xf4   :  { %3638 = vst [vmem:[#allocation32_spill] sm:$0xff] %v2551_v57  ;;  %v821_v57 = vsel %vm757_vm14, 1.0, %v3601_v9  ;;  %v2605_v23 = vadd.f32 %v506_v35, %v2473_v18  ;;  %v2608_v9 = vadd.f32 %v507_v38, %v2476_v46  ;;  %v788_v18 = vsel %vm724_vm8, 1.0, %v3640_v60 }
  0xf5   :  { %v1076_v38 = vsel %vm1012_vm9, 1.0, %v3640_v60  ;;  %v1077_v46 = vsel %vm1013_vm10, 1.0, %v3640_v60  ;;  %vm755_vm14 = vcmp.eq.s32.totalorder %v2393_v36, %v2398_v37  ;;  %v884_v7 = vadd.f32 %v820_v58, %v596_v62 }
  0xf6   :  { %v2570_v50 = vpop.permute.xlu1 %633  ;;  %v885_v63 = vadd.f32 %v821_v57, %v597_v1  ;;  %v852_v24 = vadd.f32 %v788_v18, %v564_v0  ;;  %v2650_v36 = vsel %vm754_vm13, 1.0, %v3640_v60  ;;  %v2658_v0 = vsel %vm755_vm14, 1.0, %v3640_v60 }
  0xf7   :  { %705 = vperm.xlu1 %1803, %v2085_v28   ;;  %v2581_v61 = vpop.permute.xlu0 %948  ;;  %vm1044_vm5 = vcmp.eq.s32.totalorder %v2480_v55, %v2389_v32  ;;  %v2667_v15 = vsel %vm1048_vm15, 1.0, %v3640_v60  ;;  %v2670_v57 = vsel %vm1049_vm0, 1.0, %v3640_v60  ;;  %vm1045_vm6 = vcmp.eq.s32.totalorder %v2480_v55, %v2398_v37 }
  0xf8   :  { %3639 = vst [vmem:[#allocation33_spill] sm:$0xff] %v2581_v61  ;;  %v2611_v61 = vsel %vm729_vm4, 1.0, %v3640_v60  ;;  %vm1042_vm4 = vcmp.eq.s32.totalorder %v2439_v34, %v2389_v32  ;;  %3644 = vst [vmem:[#allocation36_spill] sm:$0xff] %v2667_v15  ;;  %v2678_v58 = vsel %vm1021_vm2, 1.0, %v3640_v60  ;;  %vm473_vm7 = vcmp.eq.s32.totalorder %v2530_v21, %v2398_v37 }
  0xf9   :  { %3645 = vst [vmem:[#allocation37_spill] sm:$0xff] %v2678_v58  ;;  %v2684_v1 = vadd.f32 %v1076_v38, %v852_v24  ;;  %vm1043_vm8 = vcmp.eq.s32.totalorder %v2439_v34, %v2398_v37  ;;  %vm726_vm9 = vcmp.eq.s32.totalorder %v2570_v50, %v2389_v32  ;;  %v1109_v24 = vsel %vm1045_vm6, 1.0, %v3640_v60 }
  0xfa   :  { %v2602_v59 = vpop.permute.xlu1 %681  ;;  %vm472_vm12 = vcmp.eq.s32.totalorder %v2530_v21, %v2389_v32  ;;  %vm727_vm13 = vcmp.eq.s32.totalorder %v2570_v50, %v2398_v37  ;;  %v2720_v21 = vsel %vm1043_vm8, 1.0, %v3640_v60  ;;  %v790_v6 = vsel %vm726_vm9, 1.0, %v3640_v60 }
  0xfb   :  { %1804 = vset.pattern.permute.xlu1 %v3641_v10  ;;  %v2615_v5 = vpop.permute.xlu0 %951  ;;  %vm759_vm6 = vcmp.eq.s32.totalorder %v2602_v59, %v2398_v37 }
  0xfc   :  { %3642 = vst [vmem:[#allocation34_spill] sm:$0xff] %v2615_v5  ;;  %945 = vperm.xlu1 %1804, %v1987_v12   ;;  %v853_v5 = vadd.f32 %v789_v54, %v565_v11  ;;  %v2638_v12 = vsel %vm1014_vm11, 1.0, %v3640_v60  ;;  %v1074_v11 = vsel %vm1010_vm1, 1.0, %v3640_v60  ;;  %v2689_v54 = vsel %vm1042_vm4, 1.0, %v3640_v60 }
  0xfe   :  { %v2635_v35 = vpop.permute.xlu1 %684 }
  0xff   :  { %v2644_v31 = vpop.permute.xlu0 %1002  ;;  %vm761_vm14 = vcmp.eq.s32.totalorder %v2635_v35, %v2398_v37  ;;  %vm760_vm1 = vcmp.eq.s32.totalorder %v2635_v35, %v2389_v32 }
 0x100   :  { %3643 = vst [vmem:[#allocation35_spill] sm:$0xff] %v2644_v31  ;;  %993 = vperm.xlu1 %1804, %v2085_v28   ;;  %v2674_v28 = vadd.f32 %v1077_v46, %v853_v5  ;;  %v1108_v5 = vsel %vm1044_vm5, 1.0, %v3640_v60  ;;  %v1075_v46 = vsel %vm1011_vm3, 1.0, %v3640_v60  ;;  %vm758_vm5 = vcmp.eq.s32.totalorder %v2602_v59, %v2389_v32 }
 0x101   :  { %v2722_v55 = vadd.f32 %v1108_v5, %v884_v7  ;;  %v791_v7 = vsel %vm727_vm13, 1.0, %v3640_v60  ;;  %vm1020_vm13 = vcmp.eq.s32.totalorder %v2401_v25, %v2389_v32  ;;  %v3648_v25 = vld [vmem:[#allocation6_spill] sm:$0xff] }
 0x102   :  { %v855_v58 = vadd.f32 %v791_v7, %v2576_v17 }
 0x103   :  { %v2682_v62 = vpop.permute.xlu1 %924 }
 0x104   :  { %996 = vperm.xlu1 %1804, %v2080_v27   ;;  %v340_v18 = vpop.permute.xlu0 %339  ;;  %v537_v27 = vsel %vm473_vm7, 1.0, %v3640_v60  ;;  %vm1017_vm2 = vcmp.eq.s32.totalorder %v2682_v62, %v2398_v37  ;;  %vm1016_vm7 = vcmp.eq.s32.totalorder %v2682_v62, %v2389_v32 }
 0x105   :  { %vm434_vm10 = vcmp.eq.s32.totalorder %v340_v18, %v2389_v32  ;;  %vm435_vm11 = vcmp.eq.s32.totalorder %v340_v18, %v2398_v37  ;;  %v1081_v17 = vsel %vm1017_vm2, 1.0, %v3640_v60 }
 0x106   :  { %v498_v19 = vsel %vm434_vm10, 1.0, %v3640_v60  ;;  %v499_v38 = vsel %vm435_vm11, 1.0, %v3640_v60 }
 0x107   :  { %v562_v31 = vadd.f32 %v498_v19, %v2430_v33  ;;  %v563_v18 = vadd.f32 %v499_v38, %v2433_v40  ;;  %v2714_v15 = vpop.permute.xlu1 %969  ;;  %v2728_v19 = vadd.f32 %v1109_v24, %v885_v63  ;;  %v536_v40 = vsel %vm472_vm12, 1.0, %v3640_v60 }
 0x108   :  { %1805 = vset.pattern.permute.xlu1 %v3646_v3  ;;  %v349_v33 = vpop.permute.xlu0 %348  ;;  %v601_v38 = vadd.f32 %v537_v27, %v2511_v48  ;;  %v854_v24 = vadd.f32 %v790_v6, %v2573_v16  ;;  %v824_v6 = vsel %vm760_vm1, 1.0, %v3640_v60  ;;  %vm1047_vm8 = vcmp.eq.s32.totalorder %v2714_v15, %v2398_v37 }
 0x109   :  { %v850_v34 = vadd.f32 %v2544_v41, %v562_v31  ;;  %vm440_vm15 = vcmp.eq.s32.totalorder %v349_v33, %v2389_v32  ;;  %378 = vperm.xlu1 %1805, %v1996_v13   ;;  %vm441_vm0 = vcmp.eq.s32.totalorder %v349_v33, %v2398_v37  ;;  %v851_v5 = vadd.f32 %v2560_v22, %v563_v18 }
 0x10a   :  { %v504_v63 = vsel %vm440_vm15, 1.0, %v3640_v60  ;;  %v825_v41 = vsel %vm761_vm14, 1.0, %v3640_v60  ;;  %v505_v13 = vsel %vm441_vm0, 1.0, %v3640_v60  ;;  %vm1046_vm14 = vcmp.eq.s32.totalorder %v2714_v15, %v2389_v32  ;;  %v3649_v15 = vld [vmem:[#allocation31_spill] sm:$0xff] }
 0x10b   :  { %v568_v48 = vadd.f32 %v504_v63, %v2442_v4  ;;  %v569_v50 = vadd.f32 %v505_v13, %v2451_v29  ;;  %v1139_v33 = vadd.f32 %v1075_v46, %v851_v5  ;;  %v1138_v3 = vadd.f32 %v1074_v11, %v850_v34 }
 0x10c   :  { %v400_v31 = vpop.permute.xlu1 %399  ;;  %v355_v27 = vpop.permute.xlu0 %354  ;;  %v889_v16 = vadd.f32 %v825_v41, %v601_v38  ;;  %v600_v34 = vadd.f32 %v536_v40, %v2500_v52  ;;  %v1142_v5 = vadd.f32 %v2638_v12, %v854_v24 }
 0x10d   :  { %vm474_vm3 = vcmp.eq.s32.totalorder %v400_v31, %v2389_v32  ;;  %vm475_vm4 = vcmp.eq.s32.totalorder %v400_v31, %v2398_v37  ;;  %423 = vperm.xlu1 %1805, %v2097_v30   ;;  %v857_v22 = vadd.f32 %v2611_v61, %v569_v50  ;;  %v856_v61 = vadd.f32 %v2590_v26, %v568_v48 }
 0x10e   :  { %v538_v29 = vsel %vm474_vm3, 1.0, %v3640_v60  ;;  %v539_v4 = vsel %vm475_vm4, 1.0, %v3640_v60  ;;  %v1203_v11 = vpack.c.bf16 %v2674_v28, %v1139_v33  ;;  %v1202_v46 = vpack.c.bf16 %v2684_v1, %v1138_v3 }
 0x10f   :  { %v602_v7 = vadd.f32 %v538_v29, %v2533_v51  ;;  %v603_v35 = vadd.f32 %v539_v4, %v2536_v56  ;;  %v1145_v63 = vadd.f32 %v1081_v17, %v857_v22  ;;  %v1143_v26 = vadd.f32 %v2647_v45, %v855_v58 }
 0x110   :  { %v2772_v18 = vpop.permute.xlu0 %360  ;;  %v2784_v3 = vsel %vm758_vm5, 1.0, %v3640_v60  ;;  %v823_v51 = vsel %vm759_vm6, 1.0, %v3640_v60  ;;  %1470 = vmatprep.mubr.bf16.mxu0 %v1203_v11  ;;  %v2791_v52 = vadd.f32 %v824_v6, %v600_v34  ;;  %v1080_v45 = vsel %vm1016_vm7, 1.0, %v3640_v60 }
 0x111   :  { %1806 = vset.pattern.permute.xlu1 %v3637_v39  ;;  %v640_v38 = vpop.permute.xlu1 %639  ;;  %vm444_vm9 = vcmp.eq.s32.totalorder %v355_v27, %v2389_v32  ;;  %1471 = vmatmul.mubr.bf16.vlgmr.msra.gmra.mrb[0].mxu0 %v1202_v46  ;;  %v2801_v56 = vadd.f32 %v2670_v57, %v889_v16  ;;  %vm445_vm10 = vcmp.eq.s32.totalorder %v355_v27, %v2398_v37  ;;  %v1111_v57 = vsel %vm1047_vm8, 1.0, %v3640_v60 }
 0x112   :  { %663 = vperm.xlu1 %1806, %v2001_v14   ;;  %v1205_v59 = vpack.c.bf16 %v1145_v63, %v1143_v26  ;;  %v1144_v12 = vadd.f32 %v1080_v45, %v856_v61  ;;  %v2807_v58 = vadd.f32 %v2618_v20, %v602_v7  ;;  %v2810_v62 = vadd.f32 %v2621_v2, %v603_v35  ;;  %v3647_v26 = vld [vmem:[#allocation37_spill] sm:$0xff] }
 0x113   :  { %v508_v1 = vsel %vm444_vm9, 1.0, %v3640_v60  ;;  %vm730_vm15 = vcmp.eq.s32.totalorder %v640_v38, %v2389_v32  ;;  %v509_v41 = vsel %vm445_vm10, 1.0, %v3640_v60  ;;  %vm731_vm1 = vcmp.eq.s32.totalorder %v640_v38, %v2398_v37 }
 0x114   :  { %v388_v14 = vpop.permute.xlu0 %387  ;;  %1480 = vmatprep.mubr.bf16.mxu0 %v1205_v59  ;;  %v1204_v13 = vpack.c.bf16 %v1144_v12, %v1142_v5  ;;  %vm188_vm3 = vcmp.eq.s32.totalorder %v2307_v49, %v2389_v32  ;;  %v794_v50 = vsel %vm730_vm15, 1.0, %v3640_v60  ;;  %v573_v22 = vadd.f32 %v509_v41, %v2470_v47 }
 0x115   :  { %vm466_vm11 = vcmp.eq.s32.totalorder %v388_v14, %v2389_v32  ;;  %vm467_vm12 = vcmp.eq.s32.totalorder %v388_v14, %v2398_v37  ;;  %v643_v28 = vpop.permute.xlu1 %642  ;;  %v795_v29 = vsel %vm731_vm1, 1.0, %v3640_v60  ;;  %v572_v6 = vadd.f32 %v508_v1, %v2461_v8  ;;  %v1864_v1 = vld [vmem:[%s3567_s0 + $0xe0] sm:$0xff] }
 0x116   :  { %v530_v40 = vsel %vm466_vm11, 1.0, %v3640_v60  ;;  %v531_v24 = vsel %vm467_vm12, 1.0, %v3640_v60  ;;  %711 = vperm.xlu1 %1806, %v2097_v30   ;;  %vm733_vm0 = vcmp.eq.s32.totalorder %v643_v28, %v2398_v37  ;;  %vm732_vm2 = vcmp.eq.s32.totalorder %v643_v28, %v2389_v32 }
 0x117   :  { %v594_v20 = vadd.f32 %v530_v40, %v2489_v44  ;;  %v595_v2 = vadd.f32 %v531_v24, %v2492_v53  ;;  %v797_v31 = vsel %vm733_vm0, 1.0, %v3640_v60  ;;  %v796_v16 = vsel %vm732_vm2, 1.0, %v3640_v60  ;;  %v3650_v40 = vld [vmem:[#allocation36_spill] sm:$0xff] }
 0x118   :  { %v394_v48 = vpop.permute.xlu0 %393  ;;  %v858_v11 = vadd.f32 %v794_v50, %v2605_v23  ;;  %v861_v46 = vadd.f32 %v797_v31, %v573_v22  ;;  %v1084_v63 = vsel %vm1020_vm13, 1.0, %v3640_v60  ;;  %v1110_v5 = vsel %vm1046_vm14, 1.0, %v3640_v60  ;;  %v2925_v22 = vld [vmem:[%s3567_s0 + $0x70] sm:$0xff] }
 0x119   :  { %v882_v30 = vadd.f32 %v2650_v36, %v594_v20  ;;  %vm470_vm4 = vcmp.eq.s32.totalorder %v394_v48, %v2389_v32  ;;  %vm471_vm5 = vcmp.eq.s32.totalorder %v394_v48, %v2398_v37  ;;  %v2835_v44 = vpop.permute.xlu1 %690  ;;  %v883_v53 = vadd.f32 %v2658_v0, %v595_v2  ;;  %v1862_v36 = vld [vmem:[%s3567_s0 + $0xe8] sm:$0xff]  ;;  %1481 = vmatmul.mubr.bf16.gmra.mrb[4].mxu0 %v1204_v13  ;;  %v3651_v13 = vld [vmem:[#allocation12_spill] sm:$0xff] }
 0x11a   :  { %v534_v27 = vsel %vm470_vm4, 1.0, %v3640_v60  ;;  %v535_v33 = vsel %vm471_vm5, 1.0, %v3640_v60  ;;  %714 = vperm.xlu1 %1806, %v1862_v36   ;;  %vm158_vm10 = vcmp.eq.s32.totalorder %v3648_v25, %v2389_v32  ;;  %vm765_vm11 = vcmp.eq.s32.totalorder %v2835_v44, %v2398_v37 }
 0x11b   :  { %v598_v0 = vadd.f32 %v534_v27, %v2514_v43  ;;  %v599_v4 = vadd.f32 %v535_v33, %v2521_v42  ;;  %v1171_v61 = vadd.f32 %v2720_v21, %v883_v53  ;;  %v1170_v47 = vadd.f32 %v2689_v54, %v882_v30 }
 0x11c   :  { %v403_v17 = vpop.permute.xlu0 %402  ;;  %v859_v43 = vadd.f32 %v795_v29, %v2608_v9  ;;  %v860_v21 = vadd.f32 %v796_v16, %v572_v6  ;;  %v1863_v9 = vld [vmem:[%s3567_s0 + $0x68] sm:$0xff]  ;;  %v1176_v24 = vadd.f32 %v3650_v40, %v2791_v52  ;;  %vm159_vm13 = vcmp.eq.s32.totalorder %v3648_v25, %v2398_v37 }
 0x11d   :  { %v887_v34 = vadd.f32 %v823_v51, %v599_v4  ;;  %vm477_vm6 = vcmp.eq.s32.totalorder %v403_v17, %v2398_v37  ;;  %v886_v42 = vadd.f32 %v2784_v3, %v598_v0  ;;  %v1219_v7 = vpack.c.bf16 %v2728_v19, %v1171_v61  ;;  %v3653_v0 = vld [vmem:[#allocation25_spill] sm:$0xff] }
 0x11e   :  { %1807 = vset.pattern.permute.xlu1 %v3641_v10  ;;  %v928_v8 = vpop.permute.xlu1 %927  ;;  %v1218_v35 = vpack.c.bf16 %v2722_v55, %v1170_v47  ;;  %vm476_vm7 = vcmp.eq.s32.totalorder %v403_v17, %v2389_v32  ;;  %v541_v23 = vsel %vm477_vm6, 1.0, %v3640_v60  ;;  %v1149_v3 = vadd.f32 %v3647_v26, %v861_v46  ;;  %v2980_v26 = vld [vmem:[%s3567_s0 + $0xf8] sm:$0xff] }
 0x11f   :  { %vm1018_vm8 = vcmp.eq.s32.totalorder %v928_v8, %v2389_v32  ;;  %vm1019_vm9 = vcmp.eq.s32.totalorder %v928_v8, %v2398_v37  ;;  %954 = vperm.xlu1 %1807, %v1863_v9   ;;  %1550 = vmatprep.mubr.bf16.mxu1 %v1219_v7  ;;  %v1175_v38 = vadd.f32 %v1111_v57, %v887_v34  ;;  %v540_v45 = vsel %vm476_vm7, 1.0, %v3640_v60  ;;  %v2960_v8 = vld [vmem:[%s3567_s0 + $0xf0] sm:$0xff]  ;;  %v3654_v9 = vld [vmem:[#allocation28_spill] sm:$0xff] }
 0x120   :  { %v1082_v54 = vsel %vm1018_vm8, 1.0, %v3640_v60  ;;  %v1083_v19 = vsel %vm1019_vm9, 1.0, %v3640_v60  ;;  %v2873_v55 = vpop.permute.xlu0 %405  ;;  %1551 = vmatmul.mubr.bf16.vlgmr.msra.gmra.mrb[0].mxu1 %v1218_v35  ;;  %v1174_v28 = vadd.f32 %v1110_v5, %v886_v42  ;;  %v605_v57 = vadd.f32 %v541_v23, %v3649_v15  ;;  %v3656_v15 = vld [vmem:[#allocation15_spill] sm:$0xff] }
 0x121   :  { %v1147_v51 = vadd.f32 %v1083_v19, %v859_v43  ;;  %v1146_v59 = vadd.f32 %v1082_v54, %v858_v11  ;;  %v1221_v12 = vpack.c.bf16 %v2801_v56, %v1175_v38  ;;  %v252_v56 = vsel %vm188_vm3, 1.0, %v3640_v60 }
 0x122   :  { %v976_v14 = vpop.permute.xlu1 %975  ;;  %v1148_v20 = vadd.f32 %v1084_v63, %v860_v21  ;;  %vm170_vm14 = vcmp.eq.s32.totalorder %v3651_v13, %v2389_v32  ;;  %vm764_vm15 = vcmp.eq.s32.totalorder %v2835_v44, %v2389_v32  ;;  %v604_v48 = vadd.f32 %v540_v45, %v252_v56 }
 0x123   :  { %vm1051_vm12 = vcmp.eq.s32.totalorder %v976_v14, %v2398_v37  ;;  %999 = vperm.xlu1 %1807, %v1864_v1   ;;  %1560 = vmatprep.mubr.bf16.mxu1 %v1221_v12  ;;  %v1207_v41 = vpack.c.bf16 %v1149_v3, %v1147_v51  ;;  %v829_v49 = vsel %vm765_vm11, 1.0, %v3640_v60  ;;  %v1220_v50 = vpack.c.bf16 %v1176_v24, %v1174_v28  ;;  %v3655_v12 = vld [vmem:[#allocation5_spill] sm:$0xff] }
 0x124   :  { %v2903_v2 = vpop.permute.xlu0 %411  ;;  %v1115_v30 = vsel %vm1051_vm12, 1.0, %v3640_v60  ;;  %v1206_v53 = vpack.c.bf16 %v1148_v20, %v1146_v59  ;;  %vm1050_vm0 = vcmp.eq.s32.totalorder %v976_v14, %v2389_v32  ;;  %v893_v31 = vadd.f32 %v829_v49, %v605_v57  ;;  %v1868_v20 = vld [vmem:[%s3567_s0 + $0x78] sm:$0xff] }
 0x125   :  { %1490 = vmatprep.mubr.bf16.mxu0 %v1207_v41  ;;  %v3652_v27 = vmov 1   ;;  %vm171_vm3 = vcmp.eq.s32.totalorder %v3651_v13, %v2398_v37  ;;  %v828_v44 = vsel %vm764_vm15, 1.0, %v3640_v60  ;;  %vm446_vm4 = vcmp.eq.s32.totalorder %v3653_v0, %v2389_v32  ;;  %v3658_v13 = vld [vmem:[#allocation27_spill] sm:$0xff] }
 0x126   :  { %v979_v52 = vpop.permute.xlu1 %978  ;;  %1491 = vmatmul.mubr.bf16.gmra.mrb[8].mxu0 %v1206_v53  ;;  %v1179_v4 = vadd.f32 %v1115_v30, %v2810_v62  ;;  %v892_v6 = vadd.f32 %v828_v44, %v604_v48  ;;  %vm447_vm5 = vcmp.eq.s32.totalorder %v3653_v0, %v2398_v37  ;;  %v1114_v17 = vsel %vm1050_vm0, 1.0, %v3640_v60  ;;  %v3659_v0 = vld [vmem:[#allocation29_spill] sm:$0xff] }
 0x127   :  { %vm1052_vm1 = vcmp.eq.s32.totalorder %v979_v52, %v2389_v32  ;;  %vm1053_vm2 = vcmp.eq.s32.totalorder %v979_v52, %v2398_v37  ;;  %1809 = vset.pattern.permute.xlu1 %v3652_v27  ;;  %v222_v61 = vsel %vm158_vm10, 1.0, %v3640_v60  ;;  %v223_v62 = vsel %vm159_vm13, 1.0, %v3640_v60 }
 0x128   :  { %v1116_v33 = vsel %vm1052_vm1, 1.0, %v3640_v60  ;;  %v1117_v36 = vsel %vm1053_vm2, 1.0, %v3640_v60  ;;  %381 = vperm.xlu1 %1809, %v2925_v22   ;;  %v2928_v29 = vpop.permute.xlu0 %372  ;;  %1561 = vmatmul.mubr.bf16.gmra.mrb[4].mxu1 %v1220_v50  ;;  %v234_v34 = vsel %vm170_vm14, 1.0, %v3640_v60  ;;  %v235_v43 = vsel %vm171_vm3, 1.0, %v3640_v60 }
 0x129   :  { %v1181_v16 = vadd.f32 %v1117_v36, %v893_v31  ;;  %v1180_v47 = vadd.f32 %v1116_v33, %v892_v6  ;;  %v510_v42 = vsel %vm446_vm4, 1.0, %v3640_v60  ;;  %v511_v35 = vsel %vm447_vm5, 1.0, %v3640_v60 }
 0x12a   :  { %v1178_v21 = vadd.f32 %v1114_v17, %v2807_v58  ;;  %vm1022_vm8 = vcmp.eq.s32.totalorder %v3654_v9, %v2389_v32  ;;  %vm1023_vm9 = vcmp.eq.s32.totalorder %v3654_v9, %v2398_v37  ;;  %v574_v63 = vadd.f32 %v510_v42, %v222_v61 }
 0x12b   :  { %v2942_v11 = vpop.permute.xlu1 %408  ;;  %v1223_v46 = vpack.c.bf16 %v1181_v16, %v1179_v4  ;;  %v575_v5 = vadd.f32 %v511_v35, %v223_v62  ;;  %v1086_v51 = vsel %vm1022_vm8, 1.0, %v3640_v60  ;;  %v1087_v45 = vsel %vm1023_vm9, 1.0, %v3640_v60 }
 0x12c   :  { %429 = vperm.xlu1 %1809, %v2960_v8   ;;  %v376_v7 = vpop.permute.xlu0 %375  ;;  %v1222_v58 = vpack.c.bf16 %v1180_v47, %v1178_v21  ;;  %vm448_vm12 = vcmp.eq.s32.totalorder %v2772_v18, %v2389_v32  ;;  %vm449_vm13 = vcmp.eq.s32.totalorder %v2772_v18, %v2398_v37  ;;  %vm160_vm14 = vcmp.eq.s32.totalorder %v3655_v12, %v2389_v32  ;;  %v3657_v18 = vld [vmem:[#allocation16_spill] sm:$0xff] }
 0x12d   :  { %vm458_vm6 = vcmp.eq.s32.totalorder %v376_v7, %v2389_v32  ;;  %vm459_vm7 = vcmp.eq.s32.totalorder %v376_v7, %v2398_v37  ;;  %1570 = vmatprep.mubr.bf16.mxu1 %v1223_v46  ;;  %vm161_vm15 = vcmp.eq.s32.totalorder %v3655_v12, %v2398_v37  ;;  %vm192_vm0 = vcmp.eq.s32.totalorder %v3656_v15, %v2389_v32 }
 0x12e   :  { %v522_v23 = vsel %vm458_vm6, 1.0, %v3640_v60  ;;  %v523_v54 = vsel %vm459_vm7, 1.0, %v3640_v60  ;;  %vm193_vm1 = vcmp.eq.s32.totalorder %v3656_v15, %v2398_v37  ;;  %vm190_vm2 = vcmp.eq.s32.totalorder %v3657_v18, %v2389_v32 }
 0x12f   :  { %v2973_v19 = vadd.f32 %v522_v23, %v234_v34  ;;  %v2975_v38 = vadd.f32 %v523_v54, %v235_v43  ;;  %vm191_vm3 = vcmp.eq.s32.totalorder %v3657_v18, %v2398_v37  ;;  %v512_v1 = vsel %vm448_vm12, 1.0, %v3640_v60 }
 0x130   :  { %432 = vperm.xlu1 %1809, %v2980_v26   ;;  %v646_v3 = vpop.permute.xlu1 %645  ;;  %1571 = vmatmul.mubr.bf16.gmra.mrb[8].mxu1 %v1222_v58  ;;  %v513_v56 = vsel %vm449_vm13, 1.0, %v3640_v60  ;;  %v224_v41 = vsel %vm160_vm14, 1.0, %v3640_v60  ;;  %vm736_vm4 = vcmp.eq.s32.totalorder %v3658_v13, %v2389_v32  ;;  %vm737_vm5 = vcmp.eq.s32.totalorder %v3658_v13, %v2398_v37  ;;  %v3662_v13 = vld [vmem:[#allocation7_spill] sm:$0xff] }
 0x131   :  { %vm734_vm10 = vcmp.eq.s32.totalorder %v646_v3, %v2389_v32  ;;  %vm735_vm11 = vcmp.eq.s32.totalorder %v646_v3, %v2398_v37  ;;  %v256_v48 = vsel %vm192_vm0, 1.0, %v3640_v60  ;;  %v257_v49 = vsel %vm193_vm1, 1.0, %v3640_v60 }
 0x132   :  { %v798_v59 = vsel %vm734_vm10, 1.0, %v3640_v60  ;;  %v799_v14 = vsel %vm735_vm11, 1.0, %v3640_v60  ;;  %vm480_vm6 = vcmp.eq.s32.totalorder %v2942_v11, %v2389_v32  ;;  %vm481_vm7 = vcmp.eq.s32.totalorder %v2942_v11, %v2398_v37 }
 0x133   :  { %v862_v28 = vadd.f32 %v798_v59, %v574_v63  ;;  %v863_v25 = vadd.f32 %v799_v14, %v575_v5  ;;  %v254_v30 = vsel %vm190_vm2, 1.0, %v3640_v60  ;;  %v255_v52 = vsel %vm191_vm3, 1.0, %v3640_v60 }
 0x134   :  { %1811 = vset.pattern.permute.xlu1 %v3637_v39  ;;  %v694_v57 = vpop.permute.xlu1 %693  ;;  %v225_v39 = vsel %vm161_vm15, 1.0, %v3640_v60  ;;  %v576_v53 = vadd.f32 %v512_v1, %v224_v41  ;;  %v800_v27 = vsel %vm736_vm4, 1.0, %v3640_v60  ;;  %v801_v44 = vsel %vm737_vm5, 1.0, %v3640_v60  ;;  %v3660_v1 = vld [vmem:[#allocation8_spill] sm:$0xff] }
 0x135   :  { %v3008_v40 = vadd.f32 %v1086_v51, %v862_v28  ;;  %v3010_v24 = vadd.f32 %v1087_v45, %v863_v25  ;;  %672 = vperm.xlu1 %1811, %v1868_v20   ;;  %v577_v50 = vadd.f32 %v513_v56, %v225_v39  ;;  %vm478_vm8 = vcmp.eq.s32.totalorder %v2873_v55, %v2389_v32  ;;  %v3661_v56 = vld [vmem:[#allocation26_spill] sm:$0xff] }
 0x136   :  { %vm479_vm9 = vcmp.eq.s32.totalorder %v2873_v55, %v2398_v37  ;;  %v544_v33 = vsel %vm480_vm6, 1.0, %v3640_v60  ;;  %v545_v36 = vsel %vm481_vm7, 1.0, %v3640_v60  ;;  %vm1056_vm12 = vcmp.eq.s32.totalorder %v3659_v0, %v2389_v32 }
 0x137   :  { %vm1057_vm13 = vcmp.eq.s32.totalorder %v3659_v0, %v2398_v37  ;;  %vm766_vm14 = vcmp.eq.s32.totalorder %v694_v57, %v2389_v32  ;;  %vm767_vm15 = vcmp.eq.s32.totalorder %v694_v57, %v2398_v37  ;;  %v542_v55 = vsel %vm478_vm8, 1.0, %v3640_v60 }
 0x138   :  { %v697_v31 = vpop.permute.xlu1 %696  ;;  %v543_v4 = vsel %vm479_vm9, 1.0, %v3640_v60  ;;  %v864_v6 = vadd.f32 %v800_v27, %v576_v53  ;;  %v865_v16 = vadd.f32 %v801_v44, %v577_v50  ;;  %v608_v17 = vadd.f32 %v544_v33, %v256_v48 }
 0x139   :  { %717 = vperm.xlu1 %1811, %v2960_v8   ;;  %vm768_vm10 = vcmp.eq.s32.totalorder %v697_v31, %v2389_v32  ;;  %vm769_vm11 = vcmp.eq.s32.totalorder %v697_v31, %v2398_v37  ;;  %v609_v61 = vadd.f32 %v545_v36, %v257_v49  ;;  %v830_v62 = vsel %vm766_vm14, 1.0, %v3640_v60  ;;  %v3664_v31 = vld [vmem:[#allocation17_spill] sm:$0xff]  ;;  %v3665_v36 = vld [vmem:[#allocation18_spill] sm:$0xff] }
 0x13a   :  { %v832_v47 = vsel %vm768_vm10, 1.0, %v3640_v60  ;;  %v833_v11 = vsel %vm769_vm11, 1.0, %v3640_v60  ;;  %v831_v34 = vsel %vm767_vm15, 1.0, %v3640_v60  ;;  %v606_v43 = vadd.f32 %v542_v55, %v254_v30 }
 0x13b   :  { %v607_v42 = vadd.f32 %v543_v4, %v255_v52  ;;  %v896_v21 = vadd.f32 %v832_v47, %v608_v17  ;;  %v897_v9 = vadd.f32 %v833_v11, %v609_v61  ;;  %v1120_v54 = vsel %vm1056_vm12, 1.0, %v3640_v60  ;;  %v3663_v52 = vld [vmem:[#allocation30_spill] sm:$0xff] }
 0x13c   :  { %v894_v58 = vadd.f32 %v830_v62, %v606_v43  ;;  %vm162_vm4 = vcmp.eq.s32.totalorder %v3660_v1, %v2389_v32  ;;  %vm163_vm5 = vcmp.eq.s32.totalorder %v3660_v1, %v2398_v37  ;;  %vm450_vm6 = vcmp.eq.s32.totalorder %v3661_v56, %v2389_v32 }
 0x13d   :  { %1812 = vset.pattern.permute.xlu1 %v3641_v10  ;;  %v937_v46 = vpop.permute.xlu1 %936  ;;  %v895_v63 = vadd.f32 %v831_v34, %v607_v42  ;;  %v1184_v14 = vadd.f32 %v1120_v54, %v896_v21  ;;  %vm451_vm7 = vcmp.eq.s32.totalorder %v3661_v56, %v2398_v37  ;;  %v514_v20 = vsel %vm450_vm6, 1.0, %v3640_v60  ;;  %v3666_v54 = vld [vmem:[#allocation32_spill] sm:$0xff] }
 0x13e   :  { %vm1024_vm0 = vcmp.eq.s32.totalorder %v937_v46, %v2389_v32  ;;  %vm1025_vm1 = vcmp.eq.s32.totalorder %v937_v46, %v2398_v37  ;;  %957 = vperm.xlu1 %1812, %v2925_v22   ;;  %v1121_v22 = vsel %vm1057_vm13, 1.0, %v3640_v60  ;;  %v515_v41 = vsel %vm451_vm7, 1.0, %v3640_v60 }
 0x13f   :  { %v1088_v7 = vsel %vm1024_vm0, 1.0, %v3640_v60  ;;  %v1089_v35 = vsel %vm1025_vm1, 1.0, %v3640_v60  ;;  %v1185_v12 = vadd.f32 %v1121_v22, %v897_v9  ;;  %vm164_vm8 = vcmp.eq.s32.totalorder %v3662_v13, %v2389_v32 }
 0x140   :  { %v1152_v10 = vadd.f32 %v1088_v7, %v864_v6  ;;  %v1153_v23 = vadd.f32 %v1089_v35, %v865_v16  ;;  %vm165_vm9 = vcmp.eq.s32.totalorder %v3662_v13, %v2398_v37  ;;  %vm1026_vm10 = vcmp.eq.s32.totalorder %v3663_v52, %v2389_v32 }
 0x141   :  { %v982_v5 = vpop.permute.xlu1 %981  ;;  %vm1027_vm11 = vcmp.eq.s32.totalorder %v3663_v52, %v2398_v37  ;;  %vm196_vm0 = vcmp.eq.s32.totalorder %v3664_v31, %v2389_v32  ;;  %vm197_vm1 = vcmp.eq.s32.totalorder %v3664_v31, %v2398_v37  ;;  %v1090_v0 = vsel %vm1026_vm10, 1.0, %v3640_v60 }
 0x142   :  { %vm1054_vm2 = vcmp.eq.s32.totalorder %v982_v5, %v2389_v32  ;;  %vm1055_vm3 = vcmp.eq.s32.totalorder %v982_v5, %v2398_v37  ;;  %1005 = vperm.xlu1 %1812, %v2960_v8   ;;  %v1209_v3 = vpack.c.bf16 %v1153_v23, %v3010_v24  ;;  %v1208_v51 = vpack.c.bf16 %v1152_v10, %v3008_v40  ;;  %v3092_v8 = vpop.permute.xlu0 %426 }
 0x143   :  { %v1118_v45 = vsel %vm1054_vm2, 1.0, %v3640_v60  ;;  %v1119_v59 = vsel %vm1055_vm3, 1.0, %v3640_v60  ;;  %v226_v40 = vsel %vm162_vm4, 1.0, %v3640_v60  ;;  %v227_v24 = vsel %vm163_vm5, 1.0, %v3640_v60 }
 0x144   :  { %v1182_v28 = vadd.f32 %v1118_v45, %v894_v58  ;;  %v1183_v25 = vadd.f32 %v1119_v59, %v895_v63  ;;  %1500 = vmatprep.mubr.bf16.mxu0 %v1209_v3  ;;  %v578_v48 = vadd.f32 %v514_v20, %v226_v40  ;;  %v579_v49 = vadd.f32 %v515_v41, %v227_v24 }
 0x145   :  { %1501 = vmatmul.mubr.bf16.gmra.mrb[12].mxu0 %v1208_v51  ;;  %vm194_vm2 = vcmp.eq.s32.totalorder %v3665_v36, %v2389_v32  ;;  %vm195_vm3 = vcmp.eq.s32.totalorder %v3665_v36, %v2398_v37  ;;  %v1091_v55 = vsel %vm1027_vm11, 1.0, %v3640_v60  ;;  %v228_v47 = vsel %vm164_vm8, 1.0, %v3640_v60 }
 0x146   :  { %1008 = vperm.xlu1 %1812, %v2980_v26   ;;  %v367_v15 = vpop.permute.xlu1 %366  ;;  %v1225_v18 = vpack.c.bf16 %v1185_v12, %v1183_v25  ;;  %v1224_v57 = vpack.c.bf16 %v1184_v14, %v1182_v28  ;;  %v3106_v39 = vpop.permute.xlu0 %384  ;;  %v229_v11 = vsel %vm165_vm9, 1.0, %v3640_v60  ;;  %v260_v46 = vsel %vm196_vm0, 1.0, %v3640_v60 }
 0x147   :  { %vm452_vm14 = vcmp.eq.s32.totalorder %v367_v15, %v2389_v32  ;;  %vm453_vm15 = vcmp.eq.s32.totalorder %v367_v15, %v2398_v37  ;;  %v261_v62 = vsel %vm197_vm1, 1.0, %v3640_v60  ;;  %v258_v34 = vsel %vm194_vm2, 1.0, %v3640_v60 }
 0x148   :  { %1580 = vmatprep.mubr.bf16.mxu1 %v1225_v18  ;;  %v516_v6 = vsel %vm452_vm14, 1.0, %v3640_v60  ;;  %v517_v16 = vsel %vm453_vm15, 1.0, %v3640_v60  ;;  %v259_v43 = vsel %vm195_vm3, 1.0, %v3640_v60  ;;  %vm482_vm8 = vcmp.eq.s32.totalorder %v2903_v2, %v2389_v32 }
 0x149   :  { %1581 = vmatmul.mubr.bf16.gmra.mrb[12].mxu1 %v1224_v57  ;;  %v580_v42 = vadd.f32 %v516_v6, %v228_v47  ;;  %v581_v7 = vadd.f32 %v517_v16, %v229_v11  ;;  %vm483_vm9 = vcmp.eq.s32.totalorder %v2903_v2, %v2398_v37  ;;  %v546_v2 = vsel %vm482_vm8, 1.0, %v3640_v60  ;;  %v3668_v6 = vld [vmem:[#allocation10_spill] sm:$0xff] }
 0x14a   :  { %v415_v26 = vpop.permute.xlu1 %414  ;;  %v655_v27 = vpop.permute.xlu0 %654  ;;  %v547_v22 = vsel %vm483_vm9, 1.0, %v3640_v60  ;;  %v610_v28 = vadd.f32 %v546_v2, %v258_v34  ;;  %vm456_vm8 = vcmp.eq.s32.totalorder %v2928_v29, %v2389_v32  ;;  %vm457_vm9 = vcmp.eq.s32.totalorder %v2928_v29, %v2398_v37  ;;  %v3669_v29 = vld [vmem:[#allocation19_spill] sm:$0xff] }
 0x14b   :  { %vm740_vm4 = vcmp.eq.s32.totalorder %v655_v27, %v2389_v32  ;;  %vm741_vm5 = vcmp.eq.s32.totalorder %v655_v27, %v2398_v37  ;;  %vm484_vm6 = vcmp.eq.s32.totalorder %v415_v26, %v2389_v32  ;;  %vm485_vm7 = vcmp.eq.s32.totalorder %v415_v26, %v2398_v37 }
 0x14c   :  { %v804_v21 = vsel %vm740_vm4, 1.0, %v3640_v60  ;;  %v805_v9 = vsel %vm741_vm5, 1.0, %v3640_v60  ;;  %v548_v10 = vsel %vm484_vm6, 1.0, %v3640_v60  ;;  %v549_v23 = vsel %vm485_vm7, 1.0, %v3640_v60 }
 0x14d   :  { %v868_v58 = vadd.f32 %v804_v21, %v580_v42  ;;  %v869_v63 = vadd.f32 %v805_v9, %v581_v7  ;;  %v612_v5 = vadd.f32 %v548_v10, %v260_v46  ;;  %v613_v3 = vadd.f32 %v549_v23, %v261_v62  ;;  %v3671_v21 = vld [vmem:[#allocation20_spill] sm:$0xff] }
 0x14e   :  { %v611_v25 = vadd.f32 %v547_v22, %v259_v43  ;;  %vm166_vm6 = vcmp.eq.s32.totalorder %v3668_v6, %v2389_v32  ;;  %vm167_vm7 = vcmp.eq.s32.totalorder %v3668_v6, %v2398_v37  ;;  %v658_v16 = vpop.permute.xlu0 %657  ;;  %v520_v62 = vsel %vm456_vm8, 1.0, %v3640_v60 }
 0x14f   :  { %v652_v30 = vpop.permute.xlu1 %651  ;;  %v230_v47 = vsel %vm166_vm6, 1.0, %v3640_v60  ;;  %v231_v11 = vsel %vm167_vm7, 1.0, %v3640_v60  ;;  %v521_v34 = vsel %vm457_vm9, 1.0, %v3640_v60 }
 0x150   :  { %vm738_vm12 = vcmp.eq.s32.totalorder %v652_v30, %v2389_v32  ;;  %vm739_vm13 = vcmp.eq.s32.totalorder %v652_v30, %v2398_v37 }
 0x151   :  { %v802_v53 = vsel %vm738_vm12, 1.0, %v3640_v60  ;;  %v803_v50 = vsel %vm739_vm13, 1.0, %v3640_v60  ;;  %vm1060_vm12 = vcmp.eq.s32.totalorder %v3666_v54, %v2389_v32  ;;  %vm1061_vm13 = vcmp.eq.s32.totalorder %v3666_v54, %v2398_v37 }
 0x152   :  { %v866_v44 = vadd.f32 %v802_v53, %v578_v48  ;;  %v867_v33 = vadd.f32 %v803_v50, %v579_v49  ;;  %v1124_v48 = vsel %vm1060_vm12, 1.0, %v3640_v60  ;;  %v1125_v49 = vsel %vm1061_vm13, 1.0, %v3640_v60  ;;  %v709_v7 = vpop.permute.xlu0 %708 }
 0x153   :  { %v700_v4 = vpop.permute.xlu1 %699  ;;  %vm776_vm6 = vcmp.eq.s32.totalorder %v709_v7, %v2389_v32  ;;  %vm777_vm7 = vcmp.eq.s32.totalorder %v709_v7, %v2398_v37 }
 0x154   :  { %v3134_v17 = vadd.f32 %v1090_v0, %v866_v44  ;;  %v1155_v61 = vadd.f32 %v1091_v55, %v867_v33  ;;  %vm770_vm14 = vcmp.eq.s32.totalorder %v700_v4, %v2389_v32  ;;  %vm771_vm15 = vcmp.eq.s32.totalorder %v700_v4, %v2398_v37  ;;  %v3667_v4 = vld [vmem:[#allocation9_spill] sm:$0xff] }
 0x155   :  { %v834_v14 = vsel %vm770_vm14, 1.0, %v3640_v60  ;;  %v835_v12 = vsel %vm771_vm15, 1.0, %v3640_v60  ;;  %vm168_vm4 = vcmp.eq.s32.totalorder %v3667_v4, %v2389_v32  ;;  %vm169_vm5 = vcmp.eq.s32.totalorder %v3667_v4, %v2398_v37 }
 0x156   :  { %v898_v40 = vadd.f32 %v834_v14, %v610_v28  ;;  %v899_v24 = vadd.f32 %v835_v12, %v611_v25  ;;  %vm200_vm14 = vcmp.eq.s32.totalorder %v3669_v29, %v2389_v32  ;;  %vm201_vm15 = vcmp.eq.s32.totalorder %v3669_v29, %v2398_v37 }
 0x157   :  { %v703_v35 = vpop.permute.xlu1 %702  ;;  %v840_v28 = vsel %vm776_vm6, 1.0, %v3640_v60  ;;  %v841_v25 = vsel %vm777_vm7, 1.0, %v3640_v60 }
 0x158   :  { %vm772_vm10 = vcmp.eq.s32.totalorder %v703_v35, %v2389_v32  ;;  %vm773_vm11 = vcmp.eq.s32.totalorder %v703_v35, %v2398_v37  ;;  %v3670_v35 = vld [vmem:[#allocation33_spill] sm:$0xff] }
 0x159   :  { %v836_v51 = vsel %vm772_vm10, 1.0, %v3640_v60  ;;  %v837_v45 = vsel %vm773_vm11, 1.0, %v3640_v60 }
 0x15a   :  { %v900_v57 = vadd.f32 %v836_v51, %v612_v5  ;;  %v901_v1 = vadd.f32 %v837_v45, %v613_v3  ;;  %v265_v5 = vsel %vm201_vm15, 1.0, %v3640_v60 }
 0x15c   :  { %v943_v59 = vpop.permute.xlu1 %942  ;;  %v1188_v53 = vadd.f32 %v1124_v48, %v900_v57  ;;  %v1189_v50 = vadd.f32 %v1125_v49, %v901_v1 }
 0x15d   :  { %vm1028_vm0 = vcmp.eq.s32.totalorder %v943_v59, %v2389_v32  ;;  %vm1029_vm1 = vcmp.eq.s32.totalorder %v943_v59, %v2398_v37 }
 0x15e   :  { %v1092_v15 = vsel %vm1028_vm0, 1.0, %v3640_v60  ;;  %v1093_v18 = vsel %vm1029_vm1, 1.0, %v3640_v60  ;;  %vm1032_vm0 = vcmp.eq.s32.totalorder %v3670_v35, %v2389_v32  ;;  %vm1033_vm1 = vcmp.eq.s32.totalorder %v3670_v35, %v2398_v37 }
 0x15f   :  { %v1156_v56 = vadd.f32 %v1092_v15, %v868_v58  ;;  %v1157_v26 = vadd.f32 %v1093_v18, %v869_v63  ;;  %v264_v63 = vsel %vm200_vm14, 1.0, %v3640_v60  ;;  %v1096_v14 = vsel %vm1032_vm0, 1.0, %v3640_v60 }
 0x160   :  { %v988_v20 = vpop.permute.xlu1 %987  ;;  %v1097_v12 = vsel %vm1033_vm1, 1.0, %v3640_v60 }
 0x161   :  { %vm1058_vm2 = vcmp.eq.s32.totalorder %v988_v20, %v2389_v32  ;;  %vm1059_vm3 = vcmp.eq.s32.totalorder %v988_v20, %v2398_v37  ;;  %v1211_v41 = vpack.c.bf16 %v1157_v26, %v1155_v61  ;;  %v1210_v13 = vpack.c.bf16 %v1156_v56, %v3134_v17 }
 0x162   :  { %v1122_v30 = vsel %vm1058_vm2, 1.0, %v3640_v60  ;;  %v1123_v52 = vsel %vm1059_vm3, 1.0, %v3640_v60  ;;  %v232_v17 = vsel %vm168_vm4, 1.0, %v3640_v60  ;;  %v233_v61 = vsel %vm169_vm5, 1.0, %v3640_v60 }
 0x163   :  { %v1186_v31 = vadd.f32 %v1122_v30, %v898_v40  ;;  %v1187_v27 = vadd.f32 %v1123_v52, %v899_v24  ;;  %1510 = vmatprep.mubr.bf16.mxu0 %v1211_v41  ;;  %vm742_vm2 = vcmp.eq.s32.totalorder %v658_v16, %v2389_v32  ;;  %vm743_vm3 = vcmp.eq.s32.totalorder %v658_v16, %v2398_v37 }
 0x164   :  { %1511 = vmatmul.mubr.bf16.gmra.mrb[16].mxu0 %v1210_v13  ;;  %vm198_vm4 = vcmp.eq.s32.totalorder %v3671_v21, %v2389_v32  ;;  %vm199_vm5 = vcmp.eq.s32.totalorder %v3671_v21, %v2398_v37  ;;  %v584_v9 = vadd.f32 %v520_v62, %v232_v17  ;;  %v585_v10 = vadd.f32 %v521_v34, %v233_v61 }
 0x165   :  { %v370_v44 = vpop.permute.xlu1 %369  ;;  %v1227_v33 = vpack.c.bf16 %v1189_v50, %v1187_v27  ;;  %v1226_v36 = vpack.c.bf16 %v1188_v53, %v1186_v31  ;;  %v806_v3 = vsel %vm742_vm2, 1.0, %v3640_v60  ;;  %v807_v51 = vsel %vm743_vm3, 1.0, %v3640_v60 }
 0x166   :  { %vm454_vm10 = vcmp.eq.s32.totalorder %v370_v44, %v2389_v32  ;;  %vm455_vm11 = vcmp.eq.s32.totalorder %v370_v44, %v2398_v37  ;;  %v262_v27 = vsel %vm198_vm4, 1.0, %v3640_v60  ;;  %v263_v44 = vsel %vm199_vm5, 1.0, %v3640_v60 }
 0x167   :  { %1590 = vmatprep.mubr.bf16.mxu1 %v1227_v33  ;;  %v518_v43 = vsel %vm454_vm10, 1.0, %v3640_v60  ;;  %v519_v42 = vsel %vm455_vm11, 1.0, %v3640_v60 }
 0x168   :  { %1591 = vmatmul.mubr.bf16.gmra.mrb[16].mxu1 %v1226_v36  ;;  %v582_v22 = vadd.f32 %v518_v43, %v230_v47  ;;  %v583_v58 = vadd.f32 %v519_v42, %v231_v11 }
 0x169   :  { %v3203_v0 = vpop.permute.xlu1 %417 }
 0x16a   :  { %v870_v15 = vadd.f32 %v806_v3, %v582_v22  ;;  %v871_v18 = vadd.f32 %v807_v51, %v583_v58  ;;  %vm486_vm10 = vcmp.eq.s32.totalorder %v3203_v0, %v2389_v32  ;;  %vm487_vm11 = vcmp.eq.s32.totalorder %v3203_v0, %v2398_v37  ;;  %v3674_v22 = vld [vmem:[#allocation34_spill] sm:$0xff] }
 0x16b   :  { %v550_v48 = vsel %vm486_vm10, 1.0, %v3640_v60  ;;  %v551_v49 = vsel %vm487_vm11, 1.0, %v3640_v60  ;;  %vm492_vm10 = vcmp.eq.s32.totalorder %v3092_v8, %v2389_v32  ;;  %vm493_vm11 = vcmp.eq.s32.totalorder %v3092_v8, %v2398_v37  ;;  %v3675_v3 = vld [vmem:[#allocation22_spill] sm:$0xff] }
 0x16c   :  { %v614_v0 = vadd.f32 %v550_v48, %v262_v27 }
 0x16d   :  { %v421_v55 = vpop.permute.xlu1 %420 }
 0x16e   :  { %vm488_vm8 = vcmp.eq.s32.totalorder %v421_v55, %v2389_v32  ;;  %vm489_vm9 = vcmp.eq.s32.totalorder %v421_v55, %v2398_v37  ;;  %v615_v55 = vadd.f32 %v551_v49, %v263_v44 }
 0x16f   :  { %v552_v1 = vsel %vm488_vm8, 1.0, %v3640_v60  ;;  %v553_v56 = vsel %vm489_vm9, 1.0, %v3640_v60  ;;  %vm1034_vm8 = vcmp.eq.s32.totalorder %v3674_v22, %v2389_v32  ;;  %vm1035_vm9 = vcmp.eq.s32.totalorder %v3674_v22, %v2398_v37 }
 0x170   :  { %v616_v30 = vadd.f32 %v552_v1, %v264_v63  ;;  %v617_v52 = vadd.f32 %v553_v56, %v265_v5 }
 0x172   :  { %v661_v46 = vpop.permute.xlu1 %660  ;;  %v904_v4 = vadd.f32 %v840_v28, %v616_v30  ;;  %v905_v6 = vadd.f32 %v841_v25, %v617_v52  ;;  %v667_v28 = vpop.permute.xlu0 %666 }
 0x173   :  { %vm744_vm12 = vcmp.eq.s32.totalorder %v661_v46, %v2389_v32  ;;  %vm745_vm13 = vcmp.eq.s32.totalorder %v661_v46, %v2398_v37 }
 0x174   :  { %v808_v23 = vsel %vm744_vm12, 1.0, %v3640_v60  ;;  %v809_v54 = vsel %vm745_vm13, 1.0, %v3640_v60 }
 0x175   :  { %v872_v45 = vadd.f32 %v808_v23, %v584_v9  ;;  %v873_v59 = vadd.f32 %v809_v54, %v585_v10  ;;  %v3672_v10 = vld [vmem:[#allocation11_spill] sm:$0xff] }
 0x176   :  { %v706_v2 = vpop.permute.xlu1 %705  ;;  %vm172_vm4 = vcmp.eq.s32.totalorder %v3672_v10, %v2389_v32  ;;  %vm173_vm5 = vcmp.eq.s32.totalorder %v3672_v10, %v2398_v37 }
 0x177   :  { %v1160_v26 = vadd.f32 %v1096_v14, %v872_v45  ;;  %v1161_v40 = vadd.f32 %v1097_v12, %v873_v59  ;;  %vm774_vm14 = vcmp.eq.s32.totalorder %v706_v2, %v2389_v32  ;;  %vm775_vm15 = vcmp.eq.s32.totalorder %v706_v2, %v2398_v37  ;;  %v3673_v2 = vld [vmem:[#allocation21_spill] sm:$0xff] }
 0x178   :  { %v838_v33 = vsel %vm774_vm14, 1.0, %v3640_v60  ;;  %v839_v36 = vsel %vm775_vm15, 1.0, %v3640_v60  ;;  %v236_v23 = vsel %vm172_vm4, 1.0, %v3640_v60  ;;  %v237_v54 = vsel %vm173_vm5, 1.0, %v3640_v60 }
 0x179   :  { %v902_v47 = vadd.f32 %v838_v33, %v614_v0  ;;  %v903_v11 = vadd.f32 %v839_v36, %v615_v55  ;;  %vm204_vm6 = vcmp.eq.s32.totalorder %v3673_v2, %v2389_v32  ;;  %vm205_vm7 = vcmp.eq.s32.totalorder %v3673_v2, %v2398_v37 }
 0x17a   :  { %v1098_v45 = vsel %vm1034_vm8, 1.0, %v3640_v60  ;;  %v1099_v59 = vsel %vm1035_vm9, 1.0, %v3640_v60  ;;  %v556_v14 = vsel %vm492_vm10, 1.0, %v3640_v60  ;;  %v557_v12 = vsel %vm493_vm11, 1.0, %v3640_v60 }
 0x17b   :  { %v946_v57 = vpop.permute.xlu1 %945  ;;  %vm748_vm4 = vcmp.eq.s32.totalorder %v667_v28, %v2389_v32  ;;  %vm749_vm5 = vcmp.eq.s32.totalorder %v667_v28, %v2398_v37 }
 0x17c   :  { %vm1030_vm12 = vcmp.eq.s32.totalorder %v946_v57, %v2389_v32  ;;  %vm1031_vm13 = vcmp.eq.s32.totalorder %v946_v57, %v2398_v37  ;;  %v812_v49 = vsel %vm748_vm4, 1.0, %v3640_v60  ;;  %v813_v30 = vsel %vm749_vm5, 1.0, %v3640_v60 }
 0x17d   :  { %v1094_v24 = vsel %vm1030_vm12, 1.0, %v3640_v60  ;;  %v1095_v20 = vsel %vm1031_vm13, 1.0, %v3640_v60 }
 0x17e   :  { %v1158_v41 = vadd.f32 %v1094_v24, %v870_v15  ;;  %v1159_v13 = vadd.f32 %v1095_v20, %v871_v18 }
 0x17f   :  { %v994_v53 = vpop.permute.xlu1 %993 }
 0x180   :  { %vm1062_vm0 = vcmp.eq.s32.totalorder %v994_v53, %v2389_v32  ;;  %vm1063_vm1 = vcmp.eq.s32.totalorder %v994_v53, %v2398_v37  ;;  %v1213_v50 = vpack.c.bf16 %v1161_v40, %v1159_v13  ;;  %v1212_v31 = vpack.c.bf16 %v1160_v26, %v1158_v41  ;;  %v3676_v40 = vld [vmem:[#allocation35_spill] sm:$0xff] }
 0x181   :  { %v1126_v16 = vsel %vm1062_vm0, 1.0, %v3640_v60  ;;  %v1127_v17 = vsel %vm1063_vm1, 1.0, %v3640_v60  ;;  %vm202_vm0 = vcmp.eq.s32.totalorder %v3675_v3, %v2389_v32  ;;  %vm203_vm1 = vcmp.eq.s32.totalorder %v3675_v3, %v2398_v37 }
 0x182   :  { %1520 = vmatprep.mubr.bf16.mxu0 %v1213_v50  ;;  %v1190_v34 = vadd.f32 %v1126_v16, %v902_v47  ;;  %v1191_v29 = vadd.f32 %v1127_v17, %v903_v11  ;;  %v266_v56 = vsel %vm202_vm0, 1.0, %v3640_v60  ;;  %v267_v26 = vsel %vm203_vm1, 1.0, %v3640_v60 }
 0x183   :  { %v997_v61 = vpop.permute.xlu1 %996  ;;  %1521 = vmatmul.mubr.bf16.gmra.mrb[20].mxu0 %v1212_v31 }
 0x184   :  { %vm1064_vm2 = vcmp.eq.s32.totalorder %v997_v61, %v2389_v32  ;;  %vm1065_vm3 = vcmp.eq.s32.totalorder %v997_v61, %v2398_v37 }
 0x185   :  { %v1128_v46 = vsel %vm1064_vm2, 1.0, %v3640_v60  ;;  %v1129_v62 = vsel %vm1065_vm3, 1.0, %v3640_v60  ;;  %vm1068_vm2 = vcmp.eq.s32.totalorder %v3676_v40, %v2389_v32  ;;  %vm1069_vm3 = vcmp.eq.s32.totalorder %v3676_v40, %v2398_v37 }
 0x186   :  { %v1192_v43 = vadd.f32 %v1128_v46, %v904_v4  ;;  %v1193_v42 = vadd.f32 %v1129_v62, %v905_v6  ;;  %v1132_v27 = vsel %vm1068_vm2, 1.0, %v3640_v60  ;;  %v1133_v44 = vsel %vm1069_vm3, 1.0, %v3640_v60 }
 0x187   :  { %vm464_vm2 = vcmp.eq.s32.totalorder %v3106_v39, %v2389_v32  ;;  %vm465_vm3 = vcmp.eq.s32.totalorder %v3106_v39, %v2398_v37 }
 0x188   :  { %v379_v7 = vpop.permute.xlu1 %378  ;;  %v1229_v35 = vpack.c.bf16 %v1193_v42, %v1191_v29  ;;  %v1228_v21 = vpack.c.bf16 %v1192_v43, %v1190_v34  ;;  %v528_v28 = vsel %vm464_vm2, 1.0, %v3640_v60  ;;  %v529_v39 = vsel %vm465_vm3, 1.0, %v3640_v60 }
 0x189   :  { %vm460_vm14 = vcmp.eq.s32.totalorder %v379_v7, %v2389_v32  ;;  %vm461_vm15 = vcmp.eq.s32.totalorder %v379_v7, %v2398_v37 }
 0x18a   :  { %1600 = vmatprep.mubr.bf16.mxu1 %v1229_v35  ;;  %v524_v15 = vsel %vm460_vm14, 1.0, %v3640_v60  ;;  %v525_v18 = vsel %vm461_vm15, 1.0, %v3640_v60 }
 0x18b   :  { %1601 = vmatmul.mubr.bf16.gmra.mrb[20].mxu1 %v1228_v21  ;;  %v588_v41 = vadd.f32 %v524_v15, %v236_v23  ;;  %v589_v13 = vadd.f32 %v525_v18, %v237_v54 }
 0x18c   :  { %v424_v9 = vpop.permute.xlu1 %423 }
 0x18d   :  { %v876_v0 = vadd.f32 %v812_v49, %v588_v41  ;;  %v877_v55 = vadd.f32 %v813_v30, %v589_v13 }
 0x191   :  { %v664_v58 = vpop.permute.xlu1 %663 }
 0x192   :  { %vm746_vm12 = vcmp.eq.s32.totalorder %v664_v58, %v2389_v32  ;;  %vm747_vm13 = vcmp.eq.s32.totalorder %v664_v58, %v2398_v37 }
 0x193   :  { %v810_v63 = vsel %vm746_vm12, 1.0, %v3640_v60  ;;  %v811_v5 = vsel %vm747_vm13, 1.0, %v3640_v60 }
 0x194   :  { %v874_v8 = vadd.f32 %v810_v63, %v2973_v19  ;;  %v875_v51 = vadd.f32 %v811_v5, %v2975_v38  ;;  %v268_v19 = vsel %vm204_vm6, 1.0, %v3640_v60  ;;  %v269_v38 = vsel %vm205_vm7, 1.0, %v3640_v60  ;;  %v670_v5 = vpop.permute.xlu0 %669 }
 0x195   :  { %v712_v25 = vpop.permute.xlu1 %711  ;;  %v620_v24 = vadd.f32 %v556_v14, %v268_v19  ;;  %v621_v20 = vadd.f32 %v557_v12, %v269_v38  ;;  %vm490_vm6 = vcmp.eq.s32.totalorder %v424_v9, %v2389_v32  ;;  %vm491_vm7 = vcmp.eq.s32.totalorder %v424_v9, %v2398_v37  ;;  %v3679_v19 = vld [vmem:[#allocation23_spill] sm:$0xff]  ;;  %v3680_v38 = vld [vmem:[#allocation24_spill] sm:$0xff] }
 0x196   :  { %v1162_v57 = vadd.f32 %v1098_v45, %v874_v8  ;;  %v1163_v1 = vadd.f32 %v1099_v59, %v875_v51  ;;  %vm778_vm10 = vcmp.eq.s32.totalorder %v712_v25, %v2389_v32  ;;  %vm779_vm11 = vcmp.eq.s32.totalorder %v712_v25, %v2398_v37  ;;  %v3677_v8 = vld [vmem:[#allocation13_spill] sm:$0xff]  ;;  %v3678_v45 = vld [vmem:[#allocation14_spill] sm:$0xff] }
 0x197   :  { %v554_v33 = vsel %vm490_vm6, 1.0, %v3640_v60  ;;  %v555_v36 = vsel %vm491_vm7, 1.0, %v3640_v60  ;;  %v842_v17 = vsel %vm778_vm10, 1.0, %v3640_v60  ;;  %v843_v61 = vsel %vm779_vm11, 1.0, %v3640_v60 }
 0x198   :  { %v618_v47 = vadd.f32 %v554_v33, %v266_v56  ;;  %v619_v11 = vadd.f32 %v555_v36, %v267_v26  ;;  %vm176_vm0 = vcmp.eq.s32.totalorder %v3677_v8, %v2389_v32  ;;  %vm177_vm1 = vcmp.eq.s32.totalorder %v3677_v8, %v2398_v37  ;;  %v3399_v51 = vpop.permute.xlu0 %720 }
 0x199   :  { %v715_v48 = vpop.permute.xlu1 %714  ;;  %vm174_vm4 = vcmp.eq.s32.totalorder %v3678_v45, %v2389_v32  ;;  %vm175_vm5 = vcmp.eq.s32.totalorder %v3678_v45, %v2398_v37  ;;  %v240_v59 = vsel %vm176_vm0, 1.0, %v3640_v60  ;;  %v241_v14 = vsel %vm177_vm1, 1.0, %v3640_v60 }
 0x19a   :  { %vm780_vm8 = vcmp.eq.s32.totalorder %v715_v48, %v2389_v32  ;;  %vm781_vm9 = vcmp.eq.s32.totalorder %v715_v48, %v2398_v37  ;;  %v906_v43 = vadd.f32 %v842_v17, %v618_v47  ;;  %v907_v42 = vadd.f32 %v843_v61, %v619_v11 }
 0x19b   :  { %v844_v52 = vsel %vm780_vm8, 1.0, %v3640_v60  ;;  %v845_v53 = vsel %vm781_vm9, 1.0, %v3640_v60  ;;  %v238_v25 = vsel %vm174_vm4, 1.0, %v3640_v60  ;;  %v239_v15 = vsel %vm175_vm5, 1.0, %v3640_v60 }
 0x19c   :  { %v908_v50 = vadd.f32 %v844_v52, %v620_v24  ;;  %v909_v31 = vadd.f32 %v845_v53, %v621_v20  ;;  %vm208_vm10 = vcmp.eq.s32.totalorder %v3679_v19, %v2389_v32  ;;  %vm209_vm11 = vcmp.eq.s32.totalorder %v3679_v19, %v2398_v37 }
 0x19d   :  { %v592_v56 = vadd.f32 %v528_v28, %v240_v59  ;;  %v593_v26 = vadd.f32 %v529_v39, %v241_v14  ;;  %v272_v48 = vsel %vm208_vm10, 1.0, %v3640_v60  ;;  %v273_v49 = vsel %vm209_vm11, 1.0, %v3640_v60 }
 0x19e   :  { %v1196_v4 = vadd.f32 %v1132_v27, %v908_v50  ;;  %v1197_v6 = vadd.f32 %v1133_v44, %v909_v31  ;;  %v955_v16 = vpop.permute.xlu1 %954  ;;  %vm784_vm4 = vcmp.eq.s32.totalorder %v3399_v51, %v2389_v32  ;;  %vm785_vm5 = vcmp.eq.s32.totalorder %v3399_v51, %v2398_v37 }
 0x19f   :  { %vm1036_vm12 = vcmp.eq.s32.totalorder %v955_v16, %v2389_v32  ;;  %vm1037_vm13 = vcmp.eq.s32.totalorder %v955_v16, %v2398_v37 }
 0x1a0   :  { %v1100_v46 = vsel %vm1036_vm12, 1.0, %v3640_v60  ;;  %v1101_v62 = vsel %vm1037_vm13, 1.0, %v3640_v60  ;;  %vm750_vm12 = vcmp.eq.s32.totalorder %v670_v5, %v2389_v32  ;;  %vm751_vm13 = vcmp.eq.s32.totalorder %v670_v5, %v2398_v37 }
 0x1a1   :  { %v1164_v34 = vadd.f32 %v1100_v46, %v876_v0  ;;  %v1165_v29 = vadd.f32 %v1101_v62, %v877_v55  ;;  %v814_v30 = vsel %vm750_vm12, 1.0, %v3640_v60  ;;  %v815_v52 = vsel %vm751_vm13, 1.0, %v3640_v60 }
 0x1a2   :  { %v1000_v7 = vpop.permute.xlu1 %999 }
 0x1a3   :  { %vm1066_vm14 = vcmp.eq.s32.totalorder %v1000_v7, %v2389_v32  ;;  %vm1067_vm15 = vcmp.eq.s32.totalorder %v1000_v7, %v2398_v37  ;;  %v1215_v35 = vpack.c.bf16 %v1165_v29, %v1163_v1  ;;  %v1214_v21 = vpack.c.bf16 %v1164_v34, %v1162_v57  ;;  %v961_v1 = vpop.permute.xlu0 %960 }
 0x1a4   :  { %v1130_v9 = vsel %vm1066_vm14, 1.0, %v3640_v60  ;;  %v1131_v10 = vsel %vm1067_vm15, 1.0, %v3640_v60  ;;  %vm206_vm14 = vcmp.eq.s32.totalorder %v3680_v38, %v2389_v32  ;;  %vm207_vm15 = vcmp.eq.s32.totalorder %v3680_v38, %v2398_v37 }
 0x1a5   :  { %v1194_v23 = vadd.f32 %v1130_v9, %v906_v43  ;;  %v1195_v54 = vadd.f32 %v1131_v10, %v907_v42  ;;  %1530 = vmatprep.mubr.bf16.mxu0 %v1215_v35  ;;  %vm1040_vm0 = vcmp.eq.s32.totalorder %v961_v1, %v2389_v32  ;;  %vm1041_vm1 = vcmp.eq.s32.totalorder %v961_v1, %v2398_v37 }
 0x1a6   :  { %1531 = vmatmul.mubr.bf16.gmra.mrb[24].mxu0 %v1214_v21  ;;  %v1104_v31 = vsel %vm1040_vm0, 1.0, %v3640_v60  ;;  %v1105_v27 = vsel %vm1041_vm1, 1.0, %v3640_v60  ;;  %v270_v7 = vsel %vm206_vm14, 1.0, %v3640_v60  ;;  %v271_v35 = vsel %vm207_vm15, 1.0, %v3640_v60 }
 0x1a7   :  { %v382_v2 = vpop.permute.xlu1 %381  ;;  %v1231_v22 = vpack.c.bf16 %v1197_v6, %v1195_v54  ;;  %v1230_v58 = vpack.c.bf16 %v1196_v4, %v1194_v23  ;;  %v848_v54 = vsel %vm784_vm4, 1.0, %v3640_v60 }
 0x1a8   :  { %vm462_vm6 = vcmp.eq.s32.totalorder %v382_v2, %v2389_v32  ;;  %vm463_vm7 = vcmp.eq.s32.totalorder %v382_v2, %v2398_v37  ;;  %v849_v2 = vsel %vm785_vm5, 1.0, %v3640_v60 }
 0x1a9   :  { %1610 = vmatprep.mubr.bf16.mxu1 %v1231_v22  ;;  %v526_v18 = vsel %vm462_vm6, 1.0, %v3640_v60  ;;  %v527_v57 = vsel %vm463_vm7, 1.0, %v3640_v60 }
 0x1aa   :  { %1611 = vmatmul.mubr.bf16.gmra.mrb[24].mxu1 %v1230_v58  ;;  %v590_v41 = vadd.f32 %v526_v18, %v238_v25  ;;  %v591_v13 = vadd.f32 %v527_v57, %v239_v15  ;;  %v3681_v18 = vlaneseq }
 0x1ab   :  { %v3389_v63 = vpop.permute.xlu1 %429 }
 0x1ac   :  { %v878_v44 = vadd.f32 %v814_v30, %v590_v41  ;;  %v879_v33 = vadd.f32 %v815_v52, %v591_v13  ;;  %vm494_vm6 = vcmp.eq.s32.totalorder %v3389_v63, %v2389_v32  ;;  %vm495_vm7 = vcmp.eq.s32.totalorder %v3389_v63, %v2398_v37 }
 0x1ad   :  { %v558_v11 = vsel %vm494_vm6, 1.0, %v3640_v60  ;;  %v559_v46 = vsel %vm495_vm7, 1.0, %v3640_v60  ;;  %v1269_v57 = vshrl.u32 %v3681_v18, 7 }
 0x1ae   :  { %v622_v10 = vadd.f32 %v558_v11, %v270_v7  ;;  %v623_v23 = vadd.f32 %v559_v46, %v271_v35 }
 0x1af   :  { %v433_v3 = vpop.permute.xlu1 %432  ;;  %v1270_v1 = vsub.s32 0, %v1269_v57 }
 0x1b0   :  { %vm496_vm2 = vcmp.eq.s32.totalorder %v433_v3, %v2389_v32  ;;  %vm497_vm3 = vcmp.eq.s32.totalorder %v433_v3, %v2398_v37 }
 0x1b1   :  { %v560_v0 = vsel %vm496_vm2, 1.0, %v3640_v60  ;;  %v561_v55 = vsel %vm497_vm3, 1.0, %v3640_v60 }
 0x1b2   :  { %v624_v62 = vadd.f32 %v560_v0, %v272_v48  ;;  %v625_v34 = vadd.f32 %v561_v55, %v273_v49 }
 0x1b4   :  { %v673_v12 = vpop.permute.xlu1 %672  ;;  %v912_v5 = vadd.f32 %v848_v54, %v624_v62  ;;  %v913_v3 = vadd.f32 %v849_v2, %v625_v34 }
 0x1b5   :  { %vm752_vm8 = vcmp.eq.s32.totalorder %v673_v12, %v2389_v32  ;;  %vm753_vm9 = vcmp.eq.s32.totalorder %v673_v12, %v2398_v37 }
 0x1b6   :  { %v816_v40 = vsel %vm752_vm8, 1.0, %v3640_v60  ;;  %v817_v24 = vsel %vm753_vm9, 1.0, %v3640_v60 }
 0x1b7   :  { %v880_v53 = vadd.f32 %v816_v40, %v592_v56  ;;  %v881_v50 = vadd.f32 %v817_v24, %v593_v26 }
 0x1b8   :  { %v718_v20 = vpop.permute.xlu1 %717 }
 0x1b9   :  { %v1168_v4 = vadd.f32 %v1104_v31, %v880_v53  ;;  %v1169_v6 = vadd.f32 %v1105_v27, %v881_v50  ;;  %vm782_vm10 = vcmp.eq.s32.totalorder %v718_v20, %v2389_v32  ;;  %vm783_vm11 = vcmp.eq.s32.totalorder %v718_v20, %v2398_v37 }
 0x1ba   :  { %v846_v21 = vsel %vm782_vm10, 1.0, %v3640_v60  ;;  %v847_v9 = vsel %vm783_vm11, 1.0, %v3640_v60 }
 0x1bb   :  { %v910_v8 = vadd.f32 %v846_v21, %v622_v10  ;;  %v911_v45 = vadd.f32 %v847_v9, %v623_v23 }
 0x1bd   :  { %v958_v36 = vpop.permute.xlu1 %957 }
 0x1be   :  { %vm1038_vm8 = vcmp.eq.s32.totalorder %v958_v36, %v2389_v32  ;;  %vm1039_vm9 = vcmp.eq.s32.totalorder %v958_v36, %v2398_v37 }
 0x1bf   :  { %v1102_v16 = vsel %vm1038_vm8, 1.0, %v3640_v60  ;;  %v1103_v17 = vsel %vm1039_vm9, 1.0, %v3640_v60 }
 0x1c0   :  { %v1166_v61 = vadd.f32 %v1102_v16, %v878_v44  ;;  %v1167_v47 = vadd.f32 %v1103_v17, %v879_v33 }
 0x1c1   :  { %v1006_v29 = vpop.permute.xlu1 %1005 }
 0x1c2   :  { %vm1070_vm12 = vcmp.eq.s32.totalorder %v1006_v29, %v2389_v32  ;;  %vm1071_vm13 = vcmp.eq.s32.totalorder %v1006_v29, %v2398_v37  ;;  %v1217_v43 = vpack.c.bf16 %v1169_v6, %v1167_v47  ;;  %v1216_v42 = vpack.c.bf16 %v1168_v4, %v1166_v61 }
 0x1c3   :  { %v1134_v22 = vsel %vm1070_vm12, 1.0, %v3640_v60  ;;  %v1135_v58 = vsel %vm1071_vm13, 1.0, %v3640_v60 }
 0x1c4   :  { %1540 = vmatprep.mubr.bf16.mxu0 %v1217_v43  ;;  %v1198_v14 = vadd.f32 %v1134_v22, %v910_v8  ;;  %v1199_v12 = vadd.f32 %v1135_v58, %v911_v45 }
 0x1c5   :  { %v1009_v63 = vpop.permute.xlu1 %1008  ;;  %1541 = vmatmul.mubr.bf16.gmra.mrb[28].mxu0 %v1216_v42 }
 0x1c6   :  { %vm1072_vm14 = vcmp.eq.s32.totalorder %v1009_v63, %v2389_v32  ;;  %vm1073_vm15 = vcmp.eq.s32.totalorder %v1009_v63, %v2398_v37  ;;  %v1266_v32 = vld [vmem:[%s3569_s2] sm:$0x3]  ;;  %v1274_v37 = vsub.s32 1, %v1269_v57  ;;  %s1898_s2 = smov [#allocation2]  }
 0x1c7   :  { %v1136_v59 = vsel %vm1072_vm14, 1.0, %v3640_v60  ;;  %v1137_v51 = vsel %vm1073_vm15, 1.0, %v3640_v60  ;;  %v3487_v19 = vrot.slane %v1266_v32, %v1270_v1  ;;  %s1700_s19 = sshll.u32 %s1898_s2, 4  ;;  %s1701_s19 = int_to_ptr.vmem [resolvable:$true] %s1700_s19 }
 0x1c8   :  { %v1200_v28 = vadd.f32 %v1136_v59, %v912_v5  ;;  %v1201_v39 = vadd.f32 %v1137_v51, %v913_v3  ;;  %v3489_v38 = vrot.slane %v1266_v32, %v1274_v37  ;;  %s1869_s20 = scalar_lea.vmem %s1701_s19, 8192  ;;  %p1874_p1 = scmp.lt.s32.totalorder %s1701_s19, %s1701_s19 }
 0x1c9   :  { %p1870_p0 = scmp.ne.s32.totalorder %s1701_s19, %s1869_s20  ;;  %p1875_p2 = scmp.lt.s32.totalorder %s1869_s20, %s1869_s20 }
 0x1ca   :  { %v1233_v25 = vpack.c.bf16 %v1201_v39, %v1199_v12  ;;  %v1232_v15 = vpack.c.bf16 %v1200_v28, %v1198_v14 }
 0x1cb   :  { %p1876_p3 = por %p1875_p2, %p1874_p1 }
 0x1cc   :  { %1620 = vmatprep.mubr.bf16.mxu1 %v1233_v25 }
 0x1cd   :  { %1621 = vmatmul.mubr.bf16.gmra.mrb[28].mxu1 %v1232_v15  ;;  %p1877_p4 = pnand %p1876_p3, %p1870_p0 }
 0x1e4   :  { %v1472_v60 = vpop.f32.mrb[0].mxu0 }
 0x1e5   :  { %v1473_v56 = vadd.f32 %v1472_v60, %v3487_v19  ;;  %v1474_v26 = vpop.f32.mrb[1].mxu0 }
 0x1e6   :  { %v1475_v40 = vadd.f32 %v1474_v26, %v3489_v38  ;;  %v1476_v24 = vpop.f32.mrb[2].mxu0 }
 0x1e7   :  { %1631 = vst [vmem:[#allocation2] sm:$0xff] %v1473_v56  ;;  %v1477_v20 = vadd.f32 %v1476_v24, %v3487_v19  ;;  %v1478_v41 = vpop.f32.mrb[3].mxu0 }
 0x1e8   :  { %1632 = vst [vmem:[#allocation2 + $0x8] sm:$0xff] %v1475_v40  ;;  %v1479_v13 = vadd.f32 %v1478_v41, %v3489_v38 }
 0x1e9   :  { %1633 = vst [vmem:[#allocation2 + $0x10] sm:$0xff] %v1477_v20 }
 0x1ea   :  { %1634 = vst [vmem:[#allocation2 + $0x18] sm:$0xff] %v1479_v13 }
 0x1ec   :  { %v1482_v48 = vpop.f32.mrb[4].mxu0 }
 0x1ed   :  { %v1483_v49 = vadd.f32 %v1482_v48, %v3487_v19  ;;  %v1484_v30 = vpop.f32.mrb[5].mxu0 }
 0x1ee   :  { %v1485_v52 = vadd.f32 %v1484_v30, %v3489_v38  ;;  %v1486_v53 = vpop.f32.mrb[6].mxu0 }
 0x1ef   :  { %1635 = vst [vmem:[#allocation2 + $0x20] sm:$0xff] %v1483_v49  ;;  %v1487_v50 = vadd.f32 %v1486_v53, %v3487_v19  ;;  %v1488_v31 = vpop.f32.mrb[7].mxu0 }
 0x1f0   :  { %1636 = vst [vmem:[#allocation2 + $0x28] sm:$0xff] %v1485_v52  ;;  %v1489_v27 = vadd.f32 %v1488_v31, %v3489_v38 }
 0x1f1   :  { %1637 = vst [vmem:[#allocation2 + $0x30] sm:$0xff] %v1487_v50 }
 0x1f2   :  { %1638 = vst [vmem:[#allocation2 + $0x38] sm:$0xff] %v1489_v27 }
 0x1f3   :  { %v1552_v44 = vpop.f32.mrb[0].mxu1 }
 0x1f4   :  { %v1553_v33 = vadd.f32 %v1552_v44, %v3487_v19  ;;  %v1554_v36 = vpop.f32.mrb[1].mxu1 }
 0x1f5   :  { %v1555_v0 = vadd.f32 %v1554_v36, %v3489_v38  ;;  %v1556_v55 = vpop.f32.mrb[2].mxu1 }
 0x1f6   :  { %1663 = vst [vmem:[#allocation2 + $0x100] sm:$0xff] %v1553_v33  ;;  %v1557_v4 = vadd.f32 %v1556_v55, %v3487_v19  ;;  %v1558_v6 = vpop.f32.mrb[3].mxu1 }
 0x1f7   :  { %1664 = vst [vmem:[#allocation2 + $0x108] sm:$0xff] %v1555_v0  ;;  %v1559_v16 = vadd.f32 %v1558_v6, %v3489_v38 }
 0x1f8   :  { %1665 = vst [vmem:[#allocation2 + $0x110] sm:$0xff] %v1557_v4 }
 0x1f9   :  { %1666 = vst [vmem:[#allocation2 + $0x118] sm:$0xff] %v1559_v16  ;;  %v1492_v17 = vpop.f32.mrb[8].mxu0 }
 0x1fa   :  { %v1493_v61 = vadd.f32 %v1492_v17, %v3487_v19  ;;  %v1494_v47 = vpop.f32.mrb[9].mxu0 }
 0x1fb   :  { %v1562_v11 = vpop.f32.mrb[4].mxu1  ;;  %v1495_v46 = vadd.f32 %v1494_v47, %v3489_v38  ;;  %v1496_v62 = vpop.f32.mrb[10].mxu0 }
 0x1fc   :  { %v1563_v34 = vadd.f32 %v1562_v11, %v3487_v19  ;;  %v1564_v29 = vpop.f32.mrb[5].mxu1  ;;  %1639 = vst [vmem:[#allocation2 + $0x40] sm:$0xff] %v1493_v61  ;;  %v1497_v43 = vadd.f32 %v1496_v62, %v3487_v19  ;;  %v1498_v42 = vpop.f32.mrb[11].mxu0 }
 0x1fd   :  { %v1565_v7 = vadd.f32 %v1564_v29, %v3489_v38  ;;  %v1566_v35 = vpop.f32.mrb[6].mxu1  ;;  %1640 = vst [vmem:[#allocation2 + $0x48] sm:$0xff] %v1495_v46  ;;  %v1499_v21 = vadd.f32 %v1498_v42, %v3489_v38 }
 0x1fe   :  { %1667 = vst [vmem:[#allocation2 + $0x120] sm:$0xff] %v1563_v34  ;;  %v1567_v9 = vadd.f32 %v1566_v35, %v3487_v19  ;;  %v1568_v10 = vpop.f32.mrb[7].mxu1  ;;  %1641 = vst [vmem:[#allocation2 + $0x50] sm:$0xff] %v1497_v43 }
 0x1ff   :  { %1668 = vst [vmem:[#allocation2 + $0x128] sm:$0xff] %v1565_v7  ;;  %v1569_v23 = vadd.f32 %v1568_v10, %v3489_v38  ;;  %1642 = vst [vmem:[#allocation2 + $0x58] sm:$0xff] %v1499_v21 }
 0x200   :  { %1669 = vst [vmem:[#allocation2 + $0x130] sm:$0xff] %v1567_v9 }
 0x201   :  { %1670 = vst [vmem:[#allocation2 + $0x138] sm:$0xff] %v1569_v23 }
 0x203   :  { %v1572_v54 = vpop.f32.mrb[8].mxu1 }
 0x204   :  { %v1573_v2 = vadd.f32 %v1572_v54, %v3487_v19  ;;  %v1574_v22 = vpop.f32.mrb[9].mxu1 }
 0x205   :  { %v1575_v58 = vadd.f32 %v1574_v22, %v3489_v38  ;;  %v1576_v63 = vpop.f32.mrb[10].mxu1 }
 0x206   :  { %1671 = vst [vmem:[#allocation2 + $0x140] sm:$0xff] %v1573_v2  ;;  %v1577_v5 = vadd.f32 %v1576_v63, %v3487_v19  ;;  %v1578_v3 = vpop.f32.mrb[11].mxu1 }
 0x207   :  { %1672 = vst [vmem:[#allocation2 + $0x148] sm:$0xff] %v1575_v58  ;;  %v1579_v8 = vadd.f32 %v1578_v3, %v3489_v38 }
 0x208   :  { %1673 = vst [vmem:[#allocation2 + $0x150] sm:$0xff] %v1577_v5 }
 0x209   :  { %1674 = vst [vmem:[#allocation2 + $0x158] sm:$0xff] %v1579_v8 }
 0x218   :  { %v1502_v45 = vpop.f32.mrb[12].mxu0 }
 0x219   :  { %v1503_v59 = vadd.f32 %v1502_v45, %v3487_v19  ;;  %v1504_v51 = vpop.f32.mrb[13].mxu0 }
 0x21a   :  { %v1505_v14 = vadd.f32 %v1504_v51, %v3489_v38  ;;  %v1506_v12 = vpop.f32.mrb[14].mxu0 }
 0x21b   :  { %1643 = vst [vmem:[#allocation2 + $0x60] sm:$0xff] %v1503_v59  ;;  %v1507_v28 = vadd.f32 %v1506_v12, %v3487_v19  ;;  %v1508_v39 = vpop.f32.mrb[15].mxu0 }
 0x21c   :  { %1644 = vst [vmem:[#allocation2 + $0x68] sm:$0xff] %v1505_v14  ;;  %v1509_v25 = vadd.f32 %v1508_v39, %v3489_v38  ;;  %v1582_v15 = vpop.f32.mrb[12].mxu1 }
 0x21d   :  { %1645 = vst [vmem:[#allocation2 + $0x70] sm:$0xff] %v1507_v28  ;;  %v1583_v18 = vadd.f32 %v1582_v15, %v3487_v19  ;;  %v1584_v57 = vpop.f32.mrb[13].mxu1 }
 0x21e   :  { %1646 = vst [vmem:[#allocation2 + $0x78] sm:$0xff] %v1509_v25  ;;  %v1585_v1 = vadd.f32 %v1584_v57, %v3489_v38  ;;  %v1586_v32 = vpop.f32.mrb[14].mxu1 }
 0x21f   :  { %1675 = vst [vmem:[#allocation2 + $0x160] sm:$0xff] %v1583_v18  ;;  %v1587_v37 = vadd.f32 %v1586_v32, %v3487_v19  ;;  %v1588_v60 = vpop.f32.mrb[15].mxu1 }
 0x220   :  { %1676 = vst [vmem:[#allocation2 + $0x168] sm:$0xff] %v1585_v1  ;;  %v1589_v56 = vadd.f32 %v1588_v60, %v3489_v38 }
 0x221   :  { %1677 = vst [vmem:[#allocation2 + $0x170] sm:$0xff] %v1587_v37 }
 0x222   :  { %1678 = vst [vmem:[#allocation2 + $0x178] sm:$0xff] %v1589_v56 }
 0x237   :  { %v1512_v26 = vpop.f32.mrb[16].mxu0 }
 0x238   :  { %v1513_v40 = vadd.f32 %v1512_v26, %v3487_v19  ;;  %v1514_v24 = vpop.f32.mrb[17].mxu0 }
 0x239   :  { %v1515_v20 = vadd.f32 %v1514_v24, %v3489_v38  ;;  %v1516_v41 = vpop.f32.mrb[18].mxu0 }
 0x23a   :  { %1647 = vst [vmem:[#allocation2 + $0x80] sm:$0xff] %v1513_v40  ;;  %v1517_v13 = vadd.f32 %v1516_v41, %v3487_v19  ;;  %v1518_v48 = vpop.f32.mrb[19].mxu0 }
 0x23b   :  { %1648 = vst [vmem:[#allocation2 + $0x88] sm:$0xff] %v1515_v20  ;;  %v1519_v49 = vadd.f32 %v1518_v48, %v3489_v38  ;;  %v1592_v30 = vpop.f32.mrb[16].mxu1 }
 0x23c   :  { %1649 = vst [vmem:[#allocation2 + $0x90] sm:$0xff] %v1517_v13  ;;  %v1593_v52 = vadd.f32 %v1592_v30, %v3487_v19  ;;  %v1594_v53 = vpop.f32.mrb[17].mxu1 }
 0x23d   :  { %1650 = vst [vmem:[#allocation2 + $0x98] sm:$0xff] %v1519_v49  ;;  %v1595_v50 = vadd.f32 %v1594_v53, %v3489_v38  ;;  %v1596_v31 = vpop.f32.mrb[18].mxu1 }
 0x23e   :  { %1679 = vst [vmem:[#allocation2 + $0x180] sm:$0xff] %v1593_v52  ;;  %v1597_v27 = vadd.f32 %v1596_v31, %v3487_v19  ;;  %v1598_v44 = vpop.f32.mrb[19].mxu1 }
 0x23f   :  { %1680 = vst [vmem:[#allocation2 + $0x188] sm:$0xff] %v1595_v50  ;;  %v1599_v33 = vadd.f32 %v1598_v44, %v3489_v38 }
 0x240   :  { %1681 = vst [vmem:[#allocation2 + $0x190] sm:$0xff] %v1597_v27 }
 0x241   :  { %1682 = vst [vmem:[#allocation2 + $0x198] sm:$0xff] %v1599_v33 }
 0x256   :  { %v1522_v36 = vpop.f32.mrb[20].mxu0 }
 0x257   :  { %v1523_v0 = vadd.f32 %v1522_v36, %v3487_v19  ;;  %v1524_v55 = vpop.f32.mrb[21].mxu0 }
 0x258   :  { %v1525_v4 = vadd.f32 %v1524_v55, %v3489_v38  ;;  %v1526_v6 = vpop.f32.mrb[22].mxu0 }
 0x259   :  { %1651 = vst [vmem:[#allocation2 + $0xa0] sm:$0xff] %v1523_v0  ;;  %v1527_v16 = vadd.f32 %v1526_v6, %v3487_v19  ;;  %v1528_v17 = vpop.f32.mrb[23].mxu0 }
 0x25a   :  { %1652 = vst [vmem:[#allocation2 + $0xa8] sm:$0xff] %v1525_v4  ;;  %v1529_v61 = vadd.f32 %v1528_v17, %v3489_v38 }
 0x25b   :  { %1653 = vst [vmem:[#allocation2 + $0xb0] sm:$0xff] %v1527_v16 }
 0x25c   :  { %1654 = vst [vmem:[#allocation2 + $0xb8] sm:$0xff] %v1529_v61 }
 0x25e   :  { %v1602_v47 = vpop.f32.mrb[20].mxu1 }
 0x25f   :  { %v1603_v11 = vadd.f32 %v1602_v47, %v3487_v19  ;;  %v1604_v46 = vpop.f32.mrb[21].mxu1 }
 0x260   :  { %v1605_v62 = vadd.f32 %v1604_v46, %v3489_v38  ;;  %v1606_v34 = vpop.f32.mrb[22].mxu1 }
 0x261   :  { %1683 = vst [vmem:[#allocation2 + $0x1a0] sm:$0xff] %v1603_v11  ;;  %v1607_v29 = vadd.f32 %v1606_v34, %v3487_v19  ;;  %v1608_v43 = vpop.f32.mrb[23].mxu1 }
 0x262   :  { %1684 = vst [vmem:[#allocation2 + $0x1a8] sm:$0xff] %v1605_v62  ;;  %v1609_v42 = vadd.f32 %v1608_v43, %v3489_v38 }
 0x263   :  { %1685 = vst [vmem:[#allocation2 + $0x1b0] sm:$0xff] %v1607_v29 }
 0x264   :  { %1686 = vst [vmem:[#allocation2 + $0x1b8] sm:$0xff] %v1609_v42 }
 0x279   :  { %v1532_v7 = vpop.f32.mrb[24].mxu0 }
 0x27a   :  { %v1533_v35 = vadd.f32 %v1532_v7, %v3487_v19  ;;  %v1534_v21 = vpop.f32.mrb[25].mxu0 }
 0x27b   :  { %v1535_v9 = vadd.f32 %v1534_v21, %v3489_v38  ;;  %v1536_v10 = vpop.f32.mrb[26].mxu0 }
 0x27c   :  { %1655 = vst [vmem:[#allocation2 + $0xc0] sm:$0xff] %v1533_v35  ;;  %v1537_v23 = vadd.f32 %v1536_v10, %v3487_v19  ;;  %v1538_v54 = vpop.f32.mrb[27].mxu0 }
 0x27d   :  { %1656 = vst [vmem:[#allocation2 + $0xc8] sm:$0xff] %v1535_v9  ;;  %v1539_v2 = vadd.f32 %v1538_v54, %v3489_v38  ;;  %v1612_v22 = vpop.f32.mrb[24].mxu1 }
 0x27e   :  { %1657 = vst [vmem:[#allocation2 + $0xd0] sm:$0xff] %v1537_v23  ;;  %v1613_v58 = vadd.f32 %v1612_v22, %v3487_v19  ;;  %v1614_v63 = vpop.f32.mrb[25].mxu1 }
 0x27f   :  { %1658 = vst [vmem:[#allocation2 + $0xd8] sm:$0xff] %v1539_v2  ;;  %v1615_v5 = vadd.f32 %v1614_v63, %v3489_v38  ;;  %v1616_v3 = vpop.f32.mrb[26].mxu1 }
 0x280   :  { %1687 = vst [vmem:[#allocation2 + $0x1c0] sm:$0xff] %v1613_v58  ;;  %v1617_v8 = vadd.f32 %v1616_v3, %v3487_v19  ;;  %v1618_v45 = vpop.f32.mrb[27].mxu1 }
 0x281   :  { %1688 = vst [vmem:[#allocation2 + $0x1c8] sm:$0xff] %v1615_v5  ;;  %v1619_v59 = vadd.f32 %v1618_v45, %v3489_v38 }
 0x282   :  { %1689 = vst [vmem:[#allocation2 + $0x1d0] sm:$0xff] %v1617_v8 }
 0x283   :  { %1690 = vst [vmem:[#allocation2 + $0x1d8] sm:$0xff] %v1619_v59 }
 0x298   :  { %v1542_v51 = vpop.f32.mrb[28].mxu0 }
 0x299   :  { %v1543_v14 = vadd.f32 %v1542_v51, %v3487_v19  ;;  %v1544_v12 = vpop.f32.mrb[29].mxu0 }
 0x29a   :  { %v1545_v28 = vadd.f32 %v1544_v12, %v3489_v38  ;;  %v1546_v39 = vpop.f32.mrb[30].mxu0 }
 0x29b   :  { %1659 = vst [vmem:[#allocation2 + $0xe0] sm:$0xff] %v1543_v14  ;;  %v1547_v25 = vadd.f32 %v1546_v39, %v3487_v19  ;;  %v1548_v15 = vpop.f32.mrb[31].mxu0 }
 0x29c   :  { %1660 = vst [vmem:[#allocation2 + $0xe8] sm:$0xff] %v1545_v28  ;;  %v1549_v18 = vadd.f32 %v1548_v15, %v3489_v38 }
 0x29d   :  { %1661 = vst [vmem:[#allocation2 + $0xf0] sm:$0xff] %v1547_v25 }
 0x29e   :  { %1662 = vst [vmem:[#allocation2 + $0xf8] sm:$0xff] %v1549_v18 }
 0x2a0   :  { %v1622_v57 = vpop.f32.mrb[28].mxu1 }
 0x2a1   :  { %v1623_v1 = vadd.f32 %v1622_v57, %v3487_v19  ;;  %v1624_v32 = vpop.f32.mrb[29].mxu1 }
 0x2a2   :  { %v1625_v37 = vadd.f32 %v1624_v32, %v3489_v38  ;;  %v1626_v60 = vpop.f32.mrb[30].mxu1 }
 0x2a3   :  { %1691 = vst [vmem:[#allocation2 + $0x1e0] sm:$0xff] %v1623_v1  ;;  %v1627_v56 = vadd.f32 %v1626_v60, %v3487_v19  ;;  %v1628_v26 = vpop.f32.mrb[31].mxu1 }
 0x2a4   :  { %1692 = vst [vmem:[#allocation2 + $0x1e8] sm:$0xff] %v1625_v37  ;;  %v1629_v40 = vadd.f32 %v1628_v26, %v3489_v38 }
 0x2a5   :  { %1693 = vst [vmem:[#allocation2 + $0x1f0] sm:$0xff] %v1627_v56 }
 0x2a6   :  { %1694 = vst [vmem:[#allocation2 + $0x1f8] sm:$0xff] %v1629_v40 }
 0x2a7   :  { %1880 = shalt.err (!%p1877_p4)
}
 0x2a8   :  { %s1881_s23 = scalar_lea.hbm %s3570_s3, 8192 }
 0x2a9   :  { %p1882_p5 = scmp.ne.s32.totalorder %s3570_s3, %s1881_s23  ;;  %p1885_p6 = scmp.lt.u32.totalorder %s1881_s23, %s3570_s3 }
 0x2ab   :  { %p1887_p7 = pnand %p1885_p6, %p1882_p5 }
 0x2ad   :  { %1890 = shalt.err (!%p1887_p7)
}
 0x2ae   :  { %s1899_s28 = smov 256   ;;  %s1900_s29 = smov 16  }
 0x2af   :  { %1706 = dma.vmem_to_hbm [thread:$0]  %s1701_s19, 8192, %s3570_s3, [#allocation3], %s1899_s28, %s1899_s28, %s1900_s29  }
 0x2b0   :  { %1891 = dma.done.wait [#allocation3], 8192  }
 0x2b1   :  { %1892 = vsyncadd [#allocation3], 4294959104 }
 0x2b2   :  { %1710 = vsyncpa [#allocation3], 1 }

</bundles_post_ra>
